<compile_context>
chip_gen: v7x
topology: tpu7x:2x2x1
jax: 0.10.0
libtpu: 0.0.40
codegen_flags: <defaults>
</compile_context>

<pallas_src>
import functools

import jax
import jax.numpy as jnp
from jax import lax
from jax.experimental import pallas as pl
from jax.experimental.pallas import tpu as pltpu


def _flash_attn_dropout_kernel(q_ref, k_ref, v_ref, bits_ref, o_ref,
                               m_sc, l_sc, acc_sc,
                               *, scale_factor, dropout_p, keep_threshold):
    kv_step = pl.program_id(2)

    @pl.when(kv_step == 0)
    def _init():
        m_sc[...] = jnp.full_like(m_sc, -jnp.inf)
        l_sc[...] = jnp.zeros_like(l_sc)
        acc_sc[...] = jnp.zeros_like(acc_sc)

    q = q_ref[...]                                    # (tq, D), input dtype
    if scale_factor != 1.0:
        q = q * scale_factor                          # fold scale into q (O(tq*D))
    k = k_ref[...]                                    # (tk, D), input dtype

    # scores: contract on the shared D axis, no explicit transpose of k.
    s = lax.dot_general(q, k, (((1,), (1,)), ((), ())),
                        preferred_element_type=jnp.float32)   # (tq, tk) f32

    m_prev = m_sc[...]                                # (tq, 1)
    m_new = jnp.maximum(m_prev, jnp.max(s, axis=-1, keepdims=True))
    alpha = jnp.exp(m_prev - m_new)                   # online-softmax rescale
    e = jnp.exp(s - m_new)                            # (tq, tk) f32

    # softmax denominator accumulates the UNmasked exp-sum.
    l_sc[...] = alpha * l_sc[...] + jnp.sum(e, axis=-1, keepdims=True)

    if dropout_p > 0.0:
        # integer-threshold dropout: keep iff bits >= round(p * 2^32)
        keep = bits_ref[...] >= jnp.uint32(keep_threshold)
        e = jnp.where(keep, e, 0.0)

    pv = jnp.dot(e.astype(v_ref.dtype), v_ref[...],
                 preferred_element_type=jnp.float32)  # (tq, Dv) f32
    acc_sc[...] = alpha * acc_sc[...] + pv
    m_sc[...] = m_new

    @pl.when(kv_step == pl.num_programs(2) - 1)
    def _finalize():
        denom = l_sc[...]
        if dropout_p > 0.0:
            # fold the 1/(1-p) dropout rescale into the same per-row reciprocal
            denom = denom * (1.0 - dropout_p)
        inv = 1.0 / denom                              # (tq, 1)
        o_ref[...] = (acc_sc[...] * inv).astype(o_ref.dtype)


def attention_with_dropout(query, key, value, scale_factor, dropout_p=0.3,
                           rng_key=None, block_q=128, block_k=128):
    B, Lq, D = query.shape
    Bk, Lk, Dk = key.shape
    Bv, Lkv, Dv = value.shape
    assert B == Bk == Bv and D == Dk and Lk == Lkv

    dropout_p = float(dropout_p)
    scale_factor = float(scale_factor)

    # Tile sizes: prefer 128 (MXU-friendly, lane-dense), fall back to full extent.
    tq = block_q if Lq % block_q == 0 else Lq
    tk = block_k if Lk % block_k == 0 else Lk
    grid = (B, Lq // tq, Lk // tk)

    # Host-side dropout bits (see module docstring).
    if dropout_p > 0.0:
        if rng_key is None:
            rng_key = jax.random.PRNGKey(0)
        bits = jax.random.bits(rng_key, (B, Lq, Lk), dtype=jnp.uint32)
        keep_threshold = min(int(round(dropout_p * (2 ** 32))), 2 ** 32 - 1)
    else:
        bits = jnp.zeros((B, Lq, Lk), dtype=jnp.uint32)   # unused by the kernel
        keep_threshold = 0

    kernel = functools.partial(
        _flash_attn_dropout_kernel,
        scale_factor=scale_factor,
        dropout_p=dropout_p,
        keep_threshold=keep_threshold,
    )

    grid_spec = pltpu.PrefetchScalarGridSpec(
        num_scalar_prefetch=0,
        grid=grid,
        in_specs=[
            pl.BlockSpec((None, tq, D), lambda b, qi, ki: (b, qi, 0)),
            pl.BlockSpec((None, tk, D), lambda b, qi, ki: (b, ki, 0)),
            pl.BlockSpec((None, tk, Dv), lambda b, qi, ki: (b, ki, 0)),
            pl.BlockSpec((None, tq, tk), lambda b, qi, ki: (b, qi, ki)),
        ],
        out_specs=pl.BlockSpec((None, tq, Dv), lambda b, qi, ki: (b, qi, 0)),
        scratch_shapes=[
            pltpu.VMEM((tq, 1), jnp.float32),    # running max m
            pltpu.VMEM((tq, 1), jnp.float32),    # running sum l
            pltpu.VMEM((tq, Dv), jnp.float32),   # output accumulator
        ],
    )

    return pl.pallas_call(
        kernel,
        out_shape=jax.ShapeDtypeStruct((B, Lq, Dv), query.dtype),
        grid_spec=grid_spec,
        compiler_params=pltpu.CompilerParams(
            dimension_semantics=("parallel", "parallel", "arbitrary"),
        ),
    )(query, key, value, bits)


if __name__ == "__main__":
    # Small, mutually-consistent shapes (the literal shapes in the source file
    # are inconsistent — that script lives in jit_fail/ for a reason).
    B, Lq, Lk, D, Dv = 2, 256, 256, 64, 128
    scale_factor = 1
    dropout_p = 0.3

    root = jax.random.PRNGKey(0)
    kq, kk, kv, kd = jax.random.split(root, 4)
    query = jax.random.normal(kq, (B, Lq, D), dtype=jnp.float32)
    key = jax.random.normal(kk, (B, Lk, D), dtype=jnp.float32)
    value = jax.random.normal(kv, (B, Lk, Dv), dtype=jnp.float32)

    out = attention_with_dropout(query, key, value, scale_factor, dropout_p,
                                 rng_key=kd)
    out = jax.block_until_ready(out)

    assert out.shape == (B, Lq, Dv)
    assert out.dtype == query.dtype
    assert bool(jnp.all(jnp.isfinite(out)))

    # Deterministic-part check: dropout disabled vs pure-JAX reference.
    out_nodrop = jax.block_until_ready(
        attention_with_dropout(query, key, value, scale_factor, 0.0)
    )
    qk = jnp.einsum("bqd,bkd->bqk", query, key) * scale_factor
    probs = jax.nn.softmax(qk, axis=-1)
    ref = jnp.einsum("bqk,bkd->bqd", probs, value)
    assert jnp.allclose(out_nodrop, ref, atol=1e-4, rtol=1e-4)

    # Dropout path must actually perturb the result.
    assert not bool(jnp.allclose(out, out_nodrop, atol=1e-3, rtol=1e-3))

    print("KERNEL_OK")
</pallas_src>

<mosaic_0001>
module attributes {stable_mosaic.version = 11 : i64} {
  func.func @_flash_attn_dropout_kernel(%arg0: i32, %arg1: i32, %arg2: i32, %arg3: memref<1x128x64xf32, #tpu.memory_space<vmem>>, %arg4: memref<1x128x64xf32, #tpu.memory_space<vmem>>, %arg5: memref<1x128x128xf32, #tpu.memory_space<vmem>>, %arg6: memref<1x128x128xi32, #tpu.memory_space<vmem>>, %arg7: memref<1x128x128xf32, #tpu.memory_space<vmem>>, %arg8: memref<128x1xf32, #tpu.memory_space<vmem>>, %arg9: memref<128x1xf32, #tpu.memory_space<vmem>>, %arg10: memref<128x128xf32, #tpu.memory_space<vmem>>) attributes {dimension_semantics = [#tpu.dimension_semantics<parallel>, #tpu.dimension_semantics<parallel>, #tpu.dimension_semantics<arbitrary>], iteration_bounds = array<i64: 2, 2, 2>, scalar_prefetch = 0 : i64, scratch_operands = 3 : i64, tpu.core_type = #tpu.core_type<tc>, window_params = [{transform_indices = @transform_0, window_bounds = array<i64: 1, 128, 64>}, {transform_indices = @transform_1, window_bounds = array<i64: 1, 128, 64>}, {transform_indices = @transform_2, window_bounds = array<i64: 1, 128, 128>}, {transform_indices = @transform_3, window_bounds = array<i64: 1, 128, 128>}, {transform_indices = @transform_4, window_bounds = array<i64: 1, 128, 128>}]} {
    %c0_i32 = arith.constant 0 : i32
    %0 = arith.cmpi eq, %arg2, %c0_i32 : i32
    %1 = arith.extui %0 : i1 to i32
    %c0_i32_0 = arith.constant 0 : i32
    %2 = arith.cmpi ne, %1, %c0_i32_0 : i32
    scf.if %2 {
      %cst_29 = arith.constant 0xFF800000 : f32
      %41 = vector.broadcast %cst_29 : f32 to vector<128x1xf32>
      %c0_30 = arith.constant 0 : index
      %c0_31 = arith.constant 0 : index
      %42 = vector.load %arg8[%c0_30, %c0_31] : memref<128x1xf32, #tpu.memory_space<vmem>>, vector<128x1xf32>
      tpu.vector_store %arg8[%c0_30, %c0_31], %41 {strides = array<i32>} : memref<128x1xf32, #tpu.memory_space<vmem>>, vector<128x1xf32>,
      %cst_32 = arith.constant 0.000000e+00 : f32
      %43 = vector.broadcast %cst_32 : f32 to vector<128x1xf32>
      %c0_33 = arith.constant 0 : index
      %c0_34 = arith.constant 0 : index
      %44 = vector.load %arg9[%c0_33, %c0_34] : memref<128x1xf32, #tpu.memory_space<vmem>>, vector<128x1xf32>
      tpu.vector_store %arg9[%c0_33, %c0_34], %43 {strides = array<i32>} : memref<128x1xf32, #tpu.memory_space<vmem>>, vector<128x1xf32>,
      %cst_35 = arith.constant 0.000000e+00 : f32
      %45 = vector.broadcast %cst_35 : f32 to vector<128x128xf32>
      %c0_36 = arith.constant 0 : index
      %c0_37 = arith.constant 0 : index
      %46 = vector.load %arg10[%c0_36, %c0_37] : memref<128x128xf32, #tpu.memory_space<vmem>>, vector<128x128xf32>
      tpu.vector_store %arg10[%c0_36, %c0_37], %45 {strides = array<i32>} : memref<128x128xf32, #tpu.memory_space<vmem>>, vector<128x128xf32>,
    } else {
    }
    %c0 = arith.constant 0 : index
    %c0_1 = arith.constant 0 : index
    %c0_2 = arith.constant 0 : index
    %3 = vector.load %arg3[%c0, %c0_1, %c0_2] : memref<1x128x64xf32, #tpu.memory_space<vmem>>, vector<1x128x64xf32>
    %4 = vector.shape_cast %3 : vector<1x128x64xf32> to vector<128x64xf32>
    %c0_3 = arith.constant 0 : index
    %c0_4 = arith.constant 0 : index
    %c0_5 = arith.constant 0 : index
    %5 = vector.load %arg4[%c0_3, %c0_4, %c0_5] : memref<1x128x64xf32, #tpu.memory_space<vmem>>, vector<1x128x64xf32>
    %6 = vector.shape_cast %5 : vector<1x128x64xf32> to vector<128x64xf32>
    %cst = arith.constant dense<0.000000e+00> : vector<128x128xf32>
    %7 = tpu.matmul %4, %6, %cst {dimension_numbers = #tpu.dot_dimension_numbers<[1], [1], [0], [0], [0, 0, 1, 0], [], []>} : vector<128x64xf32>, vector<128x64xf32>, vector<128x128xf32> -> vector<128x128xf32>
    %c0_6 = arith.constant 0 : index
    %c0_7 = arith.constant 0 : index
    %8 = vector.load %arg8[%c0_6, %c0_7] : memref<128x1xf32, #tpu.memory_space<vmem>>, vector<128x1xf32>
    %cst_8 = arith.constant dense<0xFF800000> : vector<128xf32>
    %9 = vector.multi_reduction <maximumf>, %7, %cst_8 [1] : vector<128x128xf32> to vector<128xf32>
    %10 = vector.shape_cast %9 : vector<128xf32> to vector<128x1xf32>
    %11 = arith.maximumf %8, %10 : vector<128x1xf32>
    %12 = arith.subf %8, %11 : vector<128x1xf32>
    %13 = math.exp %12 : vector<128x1xf32>
    %14 = vector.broadcast %11 : vector<128x1xf32> to vector<128x128xf32>
    %15 = arith.subf %7, %14 : vector<128x128xf32>
    %16 = math.exp %15 : vector<128x128xf32>
    %c0_9 = arith.constant 0 : index
    %c0_10 = arith.constant 0 : index
    %17 = vector.load %arg9[%c0_9, %c0_10] : memref<128x1xf32, #tpu.memory_space<vmem>>, vector<128x1xf32>
    %18 = arith.mulf %13, %17 : vector<128x1xf32>
    %cst_11 = arith.constant dense<0.000000e+00> : vector<128xf32>
    %19 = vector.multi_reduction <add>, %16, %cst_11 [1] : vector<128x128xf32> to vector<128xf32>
    %20 = vector.shape_cast %19 : vector<128xf32> to vector<128x1xf32>
    %21 = arith.addf %18, %20 : vector<128x1xf32>
    %c0_12 = arith.constant 0 : index
    %c0_13 = arith.constant 0 : index
    %22 = vector.load %arg9[%c0_12, %c0_13] : memref<128x1xf32, #tpu.memory_space<vmem>>, vector<128x1xf32>
    tpu.vector_store %arg9[%c0_12, %c0_13], %21 {strides = array<i32>} : memref<128x1xf32, #tpu.memory_space<vmem>>, vector<128x1xf32>,
    %c0_14 = arith.constant 0 : index
    %c0_15 = arith.constant 0 : index
    %c0_16 = arith.constant 0 : index
    %23 = vector.load %arg6[%c0_14, %c0_15, %c0_16] : memref<1x128x128xi32, #tpu.memory_space<vmem>>, vector<1x128x128xi32>
    %24 = vector.shape_cast %23 : vector<1x128x128xi32> to vector<128x128xi32>
    %c1288490189_i32 = arith.constant 1288490189 : i32
    %25 = vector.broadcast %c1288490189_i32 : i32 to vector<128x128xi32>
    %26 = arith.cmpi uge, %24, %25 : vector<128x128xi32>
    %cst_17 = arith.constant 0.000000e+00 : f32
    %27 = vector.broadcast %cst_17 : f32 to vector<128x128xf32>
    %28 = arith.select %26, %16, %27 : vector<128x128xi1>, vector<128x128xf32>
    %c0_18 = arith.constant 0 : index
    %c0_19 = arith.constant 0 : index
    %c0_20 = arith.constant 0 : index
    %29 = vector.load %arg5[%c0_18, %c0_19, %c0_20] : memref<1x128x128xf32, #tpu.memory_space<vmem>>, vector<1x128x128xf32>
    %30 = vector.shape_cast %29 : vector<1x128x128xf32> to vector<128x128xf32>
    %cst_21 = arith.constant dense<0.000000e+00> : vector<128x128xf32>
    %31 = tpu.matmul %28, %30, %cst_21 {dimension_numbers = #tpu.dot_dimension_numbers<[1], [0], [0], [1], [0, 0, 1, 1], [], []>} : vector<128x128xf32>, vector<128x128xf32>, vector<128x128xf32> -> vector<128x128xf32>
    %c0_22 = arith.constant 0 : index
    %c0_23 = arith.constant 0 : index
    %32 = vector.load %arg10[%c0_22, %c0_23] : memref<128x128xf32, #tpu.memory_space<vmem>>, vector<128x128xf32>
    %33 = vector.broadcast %13 : vector<128x1xf32> to vector<128x128xf32>
    %34 = arith.mulf %33, %32 : vector<128x128xf32>
    %35 = arith.addf %34, %31 : vector<128x128xf32>
    %c0_24 = arith.constant 0 : index
    %c0_25 = arith.constant 0 : index
    %36 = vector.load %arg10[%c0_24, %c0_25] : memref<128x128xf32, #tpu.memory_space<vmem>>, vector<128x128xf32>
    tpu.vector_store %arg10[%c0_24, %c0_25], %35 {strides = array<i32>} : memref<128x128xf32, #tpu.memory_space<vmem>>, vector<128x128xf32>,
    %c0_26 = arith.constant 0 : index
    %c0_27 = arith.constant 0 : index
    %37 = vector.load %arg8[%c0_26, %c0_27] : memref<128x1xf32, #tpu.memory_space<vmem>>, vector<128x1xf32>
    tpu.vector_store %arg8[%c0_26, %c0_27], %11 {strides = array<i32>} : memref<128x1xf32, #tpu.memory_space<vmem>>, vector<128x1xf32>,
    %c1_i32 = arith.constant 1 : i32
    %38 = arith.cmpi eq, %arg2, %c1_i32 : i32
    %39 = arith.extui %38 : i1 to i32
    %c0_i32_28 = arith.constant 0 : i32
    %40 = arith.cmpi ne, %39, %c0_i32_28 : i32
    scf.if %40 {
      %c0_29 = arith.constant 0 : index
      %c0_30 = arith.constant 0 : index
      %41 = vector.load %arg9[%c0_29, %c0_30] : memref<128x1xf32, #tpu.memory_space<vmem>>, vector<128x1xf32>
      %cst_31 = arith.constant 0.699999988 : f32
      %42 = vector.broadcast %cst_31 : f32 to vector<128x1xf32>
      %43 = arith.mulf %41, %42 : vector<128x1xf32>
      %cst_32 = arith.constant 1.000000e+00 : f32
      %44 = vector.broadcast %cst_32 : f32 to vector<128x1xf32>
      %45 = arith.divf %44, %43 : vector<128x1xf32>
      %c0_33 = arith.constant 0 : index
      %c0_34 = arith.constant 0 : index
      %46 = vector.load %arg10[%c0_33, %c0_34] : memref<128x128xf32, #tpu.memory_space<vmem>>, vector<128x128xf32>
      %47 = vector.broadcast %45 : vector<128x1xf32> to vector<128x128xf32>
      %48 = arith.mulf %46, %47 : vector<128x128xf32>
      %c0_35 = arith.constant 0 : index
      %c0_36 = arith.constant 0 : index
      %c0_37 = arith.constant 0 : index
      %49 = vector.load %arg7[%c0_35, %c0_36, %c0_37] : memref<1x128x128xf32, #tpu.memory_space<vmem>>, vector<1x128x128xf32>
      %50 = vector.shape_cast %49 : vector<1x128x128xf32> to vector<128x128xf32>
      %51 = vector.shape_cast %48 : vector<128x128xf32> to vector<1x128x128xf32>
      tpu.vector_store %arg7[%c0_35, %c0_36, %c0_37], %51 {strides = array<i32>} : memref<1x128x128xf32, #tpu.memory_space<vmem>>, vector<1x128x128xf32>,
    } else {
    }
    return
  }
  func.func @transform_0(%arg0: i32, %arg1: i32, %arg2: i32) -> (i32, i32, i32) {
    %c0_i32 = arith.constant 0 : i32
    %c0_i32_0 = arith.constant 0 : i32
    return %arg0, %arg1, %c0_i32 : i32, i32, i32
  }
  func.func @transform_1(%arg0: i32, %arg1: i32, %arg2: i32) -> (i32, i32, i32) {
    %c0_i32 = arith.constant 0 : i32
    %c0_i32_0 = arith.constant 0 : i32
    return %arg0, %arg2, %c0_i32 : i32, i32, i32
  }
  func.func @transform_2(%arg0: i32, %arg1: i32, %arg2: i32) -> (i32, i32, i32) {
    %c0_i32 = arith.constant 0 : i32
    %c0_i32_0 = arith.constant 0 : i32
    return %arg0, %arg2, %c0_i32 : i32, i32, i32
  }
  func.func @transform_3(%arg0: i32, %arg1: i32, %arg2: i32) -> (i32, i32, i32) {
    %c0_i32 = arith.constant 0 : i32
    return %arg0, %arg1, %arg2 : i32, i32, i32
  }
  func.func @transform_4(%arg0: i32, %arg1: i32, %arg2: i32) -> (i32, i32, i32) {
    %c0_i32 = arith.constant 0 : i32
    %c0_i32_0 = arith.constant 0 : i32
    return %arg0, %arg1, %c0_i32 : i32, i32, i32
  }
}

</mosaic_0001>

<bundles_post_ra>
// kernel: tpu_custom_call.1
= control target key start
LH: loop header
LB: loop body
LE: loop exit
PB: predicated region body
PF: predicated region fallthrough
CT: control target
= control target key end

     0   :  { %s3250_s0 = inlined_call_operand.vmem [shape: f32[2,256,64], index: 0, kind: input, shape index: {}]   ;;  %s3251_s1 = inlined_call_operand.vmem [shape: f32[2,256,64], index: 1, kind: input, shape index: {}]   ;;  %s3252_s2 = inlined_call_operand.vmem [shape: f32[2,256,128], index: 2, kind: input, shape index: {}]   ;;  %s3253_s3 = inlined_call_operand.vmem [shape: u32[2,256,256], index: 3, kind: input, shape index: {}]   ;;  %s3254_s4 = inlined_call_operand.hbm [shape: f32[2,256,128], index: 4, kind: output, shape index: {}]  }
   0x1   :  { %3264 = sst [smem:[#allocation18_spill]] %s3253_s3 }
   0x2   :  { %9 = vsyncpa [#allocation7], 0 }
   0x3   :  { %11 = vsyncpa [#allocation7 + $0x1], 0  ;;  %s2524_s15 = smov 0   ;;  %s2526_s16 = smov 0  }
   0x4   :  { %s2528_s17 = smov 0   ;;  %s2530_s18 = smov 0  }
   0x5   :  { %s2532_s19 = smov 0   ;;  %s2534_s20 = smov 0  }
   0x6   :  { %s2536_s21 = smov 0   ;;  %s2538_s22 = smov 0  }
   0x7   :  { %s2540_s23 = smov 0   ;;  %s2542_s24 = smov 0  }
   0x8   :  { %s2544_s25 = smov 0   ;;  %s2546_s26 = smov 0  }
   0x9 LB: > { %3265 = sst [smem:[#allocation9_spill]] %s2446_s15  ;;  %s29_s27 = sadd.s32 1, %s2478_s23  ;;  %s2490_s26 = sphi %s2546_s26, %s17_s26   ;;  %s2486_s25 = sphi %s2544_s25, %s3289_s25   ;;  %s2482_s24 = sphi %s2542_s24, %s3288_s24   ;;  %s2478_s23 = sphi %s2540_s23, %s3287_s23   ;;  %s2474_s22 = sphi %s2538_s22, %s3286_s22   ;;  %s2470_s21 = sphi %s2536_s21, %s3285_s21   ;;  %s2466_s20 = sphi %s2534_s20, %s3284_s20   ;;  %s2462_s19 = sphi %s2532_s19, %s3283_s19   ;;  %s2458_s18 = sphi %s2530_s18, %s3282_s18   ;;  %s2454_s17 = sphi %s2528_s17, %s3292_s17   ;;  %s2450_s16 = sphi %s2526_s16, %s3291_s16   ;;  %s2446_s15 = sphi %s2524_s15, %s3290_s15  }
   0xa   : > { %3266 = sst [smem:[#allocation10_spill]] %s2462_s19  ;;  %p30_p0 = scmp.ge.s32.totalorder %s29_s27, 2 }
   0xb   : > { %3267 = sst [smem:[#allocation11_spill]] %s2478_s23  ;;  %s32_s28 = sadd.s32 1, %s2482_s24 }
   0xc   : > { %3268 = sst [smem:[#allocation12_spill]] %s2482_s24  ;;  %s1821_s29 = sadd.s32 4294967295, %s2490_s26  }
   0xd   : > { %3269 = sst [smem:[#allocation13_spill]] %s2486_s25  ;;  %p138_p1 = scmp.ne.s32.totalorder %s2462_s19, %s2458_s18 }
   0xe   : > { %s3294_s27 = smov (%p30_p0, %s29_s27), 0  ;;  %s3296_s28 = smov (!%p30_p0, %s32_s28), %s2482_s24 }
   0xf   : > { %3270 = sst [smem:[#allocation14_spill]] %s3294_s27  ;;  %s1822_s30 = sadd.s32 4294967294, %s2490_s26  }
  0x10   : > { %p139_p2 = scmp.eq.s32.totalorder %s2490_s26, 0  ;;  %p34_p3 = scmp.ge.s32.totalorder %s3296_s28, 2 }
  0x11   : > { %s36_s5 = sadd.s32 1, %s2486_s25  ;;  %p169_p5 = scmp.ne.s32.totalorder %s2454_s17, %s2450_s16 }
  0x12   : > { %p2595_p4 = por %p139_p2, %p138_p1  ;;  %s3298_s28 = smov (%p34_p3, %s3296_s28), 0 }
  0x13   : > { %3272 = sst [smem:[#allocation15_spill]] %s3298_s28  ;;  %s3300_s5 = smov (!%p34_p3, %s36_s5), %s2486_s25 }
  0x14   : > { %s125_s7 = ssub.s32 %s2482_s24, %s3298_s28  ;;  %p170_p6 = scmp.eq.s32.totalorder %s1821_s29, 7 }
  0x15   : > { %p38_p7 = scmp.ge.s32.totalorder %s3300_s5, 2  ;;  %p175_p8 = scmp.ne.s32.totalorder %s2450_s16, %s2446_s15 }
  0x16   : > { %p2608_p9 = por %p170_p6, %p169_p5  ;;  %p176_p10 = scmp.eq.s32.totalorder %s1822_s30, 7 }
  0x17   : > { %s3302_s5 = smov (%p38_p7, %s3300_s5), 0  ;;  %s127_s9 = ssub.s32 %s2478_s23, %s3294_s27 }
  0x18   : > { %3274 = sst [smem:[#allocation16_spill]] %s3302_s5  ;;  %p2616_p11 = por %p176_p10, %p175_p8 }
  0x19   : > { %s124_s11 = ssub.s32 %s2486_s25, %s3302_s5  ;;  %s131_s12 = sadd.s32 1, %s2462_s19 }
  0x1a   : > { %s126_s13 = sor.u32 %s125_s7, %s124_s11  ;;  %s159_s14 = sadd.s32 1, %s2454_s17 }
  0x1b   : > { %s128_s29 = sor.u32 %s127_s9, %s126_s13  ;;  %p157_p12 = scmp.eq.s32.totalorder %s126_s13, 0 }
  0x1c   : > { %p129_p13 = scmp.eq.s32.totalorder %s128_s29, 0  ;;  %p1824_p0 = scmp.ge.s32.totalorder %s2490_s26, 8 }
  0x1d   : > { %s2625_s28 = scalar_select %p157_p12, %s2454_s17, %s159_s14  }
  0x1e   : > { %s2628_s15 = scalar_select %p129_p13, %s2462_s19, %s131_s12  }
  0x1f   : > { %192 = sbr.rel (%p1824_p0) target bundleno = 57 (0x39), region = 16 }
  0x20   : > { %3276 = sst [smem:[#allocation17_spill]] %s2628_s15 }
  0x26   : > { %234 = sbr.rel (!%p2595_p4) target bundleno = 57 (0x39), region = 32  ;;  %s236_s30 = sand.u32 (%p2595_p4), 1, %s2462_s19  }
  0x27   : > { %s1898_s7 = sshll.u32 (%p2595_p4), %s2482_s24, 5  ;;  %s1825_s11 = sshll.u32 (%p2595_p4), %s236_s30, 7 }
  0x28   : > { %s241_s9 = sadd.s32 (%p2595_p4), %s2478_s23, %s1898_s7  ;;  %s1828_s13 = sshll.u32 (%p2595_p4), %s2486_s25, 6 }
  0x29   : > { %s243_s29 = sadd.s32 (%p2595_p4), %s1828_s13, %s241_s9  ;;  %s3277_s3 = sld [smem:[#allocation18_spill]] (%p2595_p4) }
  0x2a   : > { %s1829_s14 = sshll.u32 (%p2595_p4), %s243_s29, 3  ;;  %s238_s6 = scalar_lea.vmem (%p2595_p4), [#allocation5], %s1825_s11 }
  0x2f   : > { %s2640_s27 = scalar_lea.vmem %s3277_s3, %s1829_s14 }
  0x30   : > { %v303_v0 = vld [vmem:[%s2640_s27] sm:$0xff]  ;;  %v305_v1 = vld [vmem:[%s2640_s27 + $0x10] sm:$0xff] }
  0x31   : > { %v307_v2 = vld [vmem:[%s2640_s27 + $0x20] sm:$0xff]  ;;  %304 = vst [vmem:[%s238_s6] sm:$0xff] %v303_v0  ;;  %306 = vst [vmem:[%s238_s6 + $0x8] sm:$0xff] %v305_v1  ;;  %v309_v3 = vld [vmem:[%s2640_s27 + $0x30] sm:$0xff] }
  0x32   : > { %308 = vst [vmem:[%s238_s6 + $0x10] sm:$0xff] %v307_v2  ;;  %v311_v4 = vld [vmem:[%s2640_s27 + $0x40] sm:$0xff]  ;;  %v313_v5 = vld [vmem:[%s2640_s27 + $0x50] sm:$0xff]  ;;  %310 = vst [vmem:[%s238_s6 + $0x18] sm:$0xff] %v309_v3 }
  0x33   : > { %312 = vst [vmem:[%s238_s6 + $0x20] sm:$0xff] %v311_v4  ;;  %314 = vst [vmem:[%s238_s6 + $0x28] sm:$0xff] %v313_v5  ;;  %v315_v6 = vld [vmem:[%s2640_s27 + $0x60] sm:$0xff]  ;;  %v317_v7 = vld [vmem:[%s2640_s27 + $0x70] sm:$0xff] }
  0x34   : > { %v319_v8 = vld [vmem:[%s2640_s27 + $0x80] sm:$0xff]  ;;  %316 = vst [vmem:[%s238_s6 + $0x30] sm:$0xff] %v315_v6  ;;  %318 = vst [vmem:[%s238_s6 + $0x38] sm:$0xff] %v317_v7  ;;  %v321_v9 = vld [vmem:[%s2640_s27 + $0x90] sm:$0xff] }
  0x35   : > { %320 = vst [vmem:[%s238_s6 + $0x40] sm:$0xff] %v319_v8  ;;  %v323_v10 = vld [vmem:[%s2640_s27 + $0xa0] sm:$0xff]  ;;  %v325_v11 = vld [vmem:[%s2640_s27 + $0xb0] sm:$0xff]  ;;  %322 = vst [vmem:[%s238_s6 + $0x48] sm:$0xff] %v321_v9 }
  0x36   : > { %324 = vst [vmem:[%s238_s6 + $0x50] sm:$0xff] %v323_v10  ;;  %326 = vst [vmem:[%s238_s6 + $0x58] sm:$0xff] %v325_v11  ;;  %v327_v12 = vld [vmem:[%s2640_s27 + $0xc0] sm:$0xff]  ;;  %v329_v13 = vld [vmem:[%s2640_s27 + $0xd0] sm:$0xff] }
  0x37   : > { %v331_v14 = vld [vmem:[%s2640_s27 + $0xe0] sm:$0xff]  ;;  %328 = vst [vmem:[%s238_s6 + $0x60] sm:$0xff] %v327_v12  ;;  %330 = vst [vmem:[%s238_s6 + $0x68] sm:$0xff] %v329_v13  ;;  %v333_v15 = vld [vmem:[%s2640_s27 + $0xf0] sm:$0xff] }
  0x38   : > { %332 = vst [vmem:[%s238_s6 + $0x70] sm:$0xff] %v331_v14  ;;  %334 = vst [vmem:[%s238_s6 + $0x78] sm:$0xff] %v333_v15 }
  0x39 PF: > { %p1830_p1 = scmp.ge.s32.totalorder %s2490_s26, 1  ;;  %p339_p2 = scmp.lt.s32.totalorder %s2490_s26, 9 }
  0x3b   : > { %p340_p3 = pnand %p1830_p1, %p339_p2 }
  0x3c   : > { %s346_s5 = sand.u32 (!%p340_p3), 1, %s2458_s18   ;;  %s3260_s30 = sand.u32 (!%p340_p3), 1, %s2450_s16  }
  0x3d   : > { %343 = sbr.rel (%p340_p3) target bundleno = 1087 (0x43f), region = 70  ;;  %s1831_s7 = sshll.u32 (!%p340_p3), %s346_s5, 7 }
  0x3e   : > { %s1832_s27 = sshll.u32 (!%p340_p3), %s3260_s30, 7  ;;  %s2665_s11 = sshll.u32 (!%p340_p3), %s2470_s21, 4 }
  0x3f   : > { %p399_p4 = scmp.lt.s32.totalorder (!%p340_p3), %s2474_s22, 1  ;;  %p401_p5 = scmp.lt.s32.totalorder (!%p340_p3), %s2665_s11, 31 }
  0x40   : > { %s1836_s9 = sshll.u32 (!%p340_p3), %s2466_s20, 4  ;;  %p1842_p7 = scmp.ne.s32.totalorder (!%p340_p3), %s2466_s20, 0 }
  0x41   : > { %p411_p6 = scmp.lt.s32.totalorder (!%p340_p3), %s1836_s9, 31 }
  0x44   : > { %s400_s13 = scalar_select %p399_p4, %s2474_s22, 1 }
  0x45   : > { %s402_s29 = scalar_select %p401_p5, %s2665_s11, 31 }
  0x46   : > { %s1834_s14 = sshll.u32 %s400_s13, 5  ;;  %s3304_s9 = smov (!%p411_p6, %s1836_s9), 31  ;;  %vm434_vm0 = vcmask (!%p1842_p7), 7168   ;;  %v2492_v16 = vmov (!%p1842_p7), -inf   ;;  %v2493_v17 = vmov (!%p1842_p7), 0.0  }
  0x47   : > { %s404_s12 = sadd.s32 %s1834_s14, %s402_s29  ;;  %s414_s5 = sadd.s32 %s1834_s14, %s3304_s9  ;;  %435 = vst.msk [vmem:[#allocation2] sm:$0xff] (!%p1842_p7), %vm434_vm0, %v2492_v16  ;;  %436 = vst.msk [vmem:[#allocation2 + $0x8] sm:$0xff] (!%p1842_p7), %vm434_vm0, %v2492_v16 }
  0x48   : > { %s1835_s6 = sshll.u32 %s404_s12, 3  ;;  %s1838_s21 = sshll.u32 %s414_s5, 3  ;;  %437 = vst.msk [vmem:[#allocation2 + $0x10] sm:$0xff] (!%p1842_p7), %vm434_vm0, %v2492_v16  ;;  %438 = vst.msk [vmem:[#allocation2 + $0x18] sm:$0xff] (!%p1842_p7), %vm434_vm0, %v2492_v16 }
  0x49   : > { %s2675_s18 = scalar_lea.vmem %s3250_s0, %s1835_s6  ;;  %s2680_s23 = scalar_lea.vmem %s3251_s1, %s1838_s21  ;;  %439 = vst.msk [vmem:[#allocation2 + $0x20] sm:$0xff] (!%p1842_p7), %vm434_vm0, %v2492_v16  ;;  %440 = vst.msk [vmem:[#allocation2 + $0x28] sm:$0xff] (!%p1842_p7), %vm434_vm0, %v2492_v16 }
  0x4a   : > { %s2685_s13 = scalar_lea.vmem %s3252_s2, %s1838_s21  ;;  %s2687_s29 = scalar_lea.vmem [#allocation5], %s1831_s7  ;;  %441 = vst.msk [vmem:[#allocation2 + $0x30] sm:$0xff] (!%p1842_p7), %vm434_vm0, %v2492_v16  ;;  %442 = vst.msk [vmem:[#allocation2 + $0x38] sm:$0xff] (!%p1842_p7), %vm434_vm0, %v2492_v16 }
  0x4b   : > { %s2689_s12 = scalar_lea.vmem [#allocation6], %s1832_s27  ;;  %433 = sbr.rel (%p1842_p7) target bundleno = 95 (0x5f), region = 78  ;;  %443 = vst.msk [vmem:[#allocation2 + $0x40] sm:$0xff] (!%p1842_p7), %vm434_vm0, %v2492_v16  ;;  %444 = vst.msk [vmem:[#allocation2 + $0x48] sm:$0xff] (!%p1842_p7), %vm434_vm0, %v2492_v16 }
  0x4c   : > { %445 = vst.msk [vmem:[#allocation2 + $0x50] sm:$0xff] (!%p1842_p7), %vm434_vm0, %v2492_v16  ;;  %446 = vst.msk [vmem:[#allocation2 + $0x58] sm:$0xff] (!%p1842_p7), %vm434_vm0, %v2492_v16 }
  0x4d   : > { %447 = vst.msk [vmem:[#allocation2 + $0x60] sm:$0xff] (!%p1842_p7), %vm434_vm0, %v2492_v16  ;;  %448 = vst.msk [vmem:[#allocation2 + $0x68] sm:$0xff] (!%p1842_p7), %vm434_vm0, %v2492_v16 }
  0x4e   : > { %449 = vst.msk [vmem:[#allocation2 + $0x70] sm:$0xff] (!%p1842_p7), %vm434_vm0, %v2492_v16  ;;  %450 = vst.msk [vmem:[#allocation2 + $0x78] sm:$0xff] (!%p1842_p7), %vm434_vm0, %v2492_v16 }
  0x4f   : > { %451 = vst.msk [vmem:[#allocation3] sm:$0xff] (!%p1842_p7), %vm434_vm0, %v2493_v17  ;;  %452 = vst.msk [vmem:[#allocation3 + $0x8] sm:$0xff] (!%p1842_p7), %vm434_vm0, %v2493_v17 }
  0x50   : > { %453 = vst.msk [vmem:[#allocation3 + $0x10] sm:$0xff] (!%p1842_p7), %vm434_vm0, %v2493_v17  ;;  %454 = vst.msk [vmem:[#allocation3 + $0x18] sm:$0xff] (!%p1842_p7), %vm434_vm0, %v2493_v17 }
  0x51   : > { %455 = vst.msk [vmem:[#allocation3 + $0x20] sm:$0xff] (!%p1842_p7), %vm434_vm0, %v2493_v17  ;;  %456 = vst.msk [vmem:[#allocation3 + $0x28] sm:$0xff] (!%p1842_p7), %vm434_vm0, %v2493_v17 }
  0x52   : > { %457 = vst.msk [vmem:[#allocation3 + $0x30] sm:$0xff] %vm434_vm0, %v2493_v17  ;;  %458 = vst.msk [vmem:[#allocation3 + $0x38] sm:$0xff] %vm434_vm0, %v2493_v17 }
  0x53   : > { %459 = vst.msk [vmem:[#allocation3 + $0x40] sm:$0xff] %vm434_vm0, %v2493_v17  ;;  %460 = vst.msk [vmem:[#allocation3 + $0x48] sm:$0xff] %vm434_vm0, %v2493_v17 }
  0x54   : > { %461 = vst.msk [vmem:[#allocation3 + $0x50] sm:$0xff] %vm434_vm0, %v2493_v17  ;;  %462 = vst.msk [vmem:[#allocation3 + $0x58] sm:$0xff] %vm434_vm0, %v2493_v17 }
  0x55   : > { %463 = vst.msk [vmem:[#allocation3 + $0x60] sm:$0xff] %vm434_vm0, %v2493_v17  ;;  %464 = vst.msk [vmem:[#allocation3 + $0x68] sm:$0xff] %vm434_vm0, %v2493_v17 }
  0x56   : > { %465 = vst.msk [vmem:[#allocation3 + $0x70] sm:$0xff] %vm434_vm0, %v2493_v17  ;;  %466 = vst.msk [vmem:[#allocation3 + $0x78] sm:$0xff] %vm434_vm0, %v2493_v17 }
  0x57   : > { %467 = vst [vmem:[#allocation4] sm:$0xff] %v2493_v17  ;;  %468 = vst [vmem:[#allocation4 + $0x8] sm:$0xff] %v2493_v17 }
  0x58   : > { %469 = vst [vmem:[#allocation4 + $0x10] sm:$0xff] %v2493_v17  ;;  %470 = vst [vmem:[#allocation4 + $0x18] sm:$0xff] %v2493_v17 }
  0x59   : > { %471 = vst [vmem:[#allocation4 + $0x20] sm:$0xff] %v2493_v17  ;;  %472 = vst [vmem:[#allocation4 + $0x28] sm:$0xff] %v2493_v17 }
  0x5a   : > { %473 = vst [vmem:[#allocation4 + $0x30] sm:$0xff] %v2493_v17  ;;  %474 = vst [vmem:[#allocation4 + $0x38] sm:$0xff] %v2493_v17 }
  0x5b   : > { %475 = vst [vmem:[#allocation4 + $0x40] sm:$0xff] %v2493_v17  ;;  %476 = vst [vmem:[#allocation4 + $0x48] sm:$0xff] %v2493_v17 }
  0x5c   : > { %477 = vst [vmem:[#allocation4 + $0x50] sm:$0xff] %v2493_v17  ;;  %478 = vst [vmem:[#allocation4 + $0x58] sm:$0xff] %v2493_v17 }
  0x5d   : > { %479 = vst [vmem:[#allocation4 + $0x60] sm:$0xff] %v2493_v17  ;;  %480 = vst [vmem:[#allocation4 + $0x68] sm:$0xff] %v2493_v17 }
  0x5e   : > { %481 = vst [vmem:[#allocation4 + $0x70] sm:$0xff] %v2493_v17  ;;  %482 = vst [vmem:[#allocation4 + $0x78] sm:$0xff] %v2493_v17 }
  0x5f PF: > { %v499_v18 = vld [vmem:[%s2680_s23] sm:$0xff]  ;;  %v500_v19 = vld [vmem:[%s2680_s23 + $0x8] sm:$0xff]  ;;  %vm515_vm1 = vcmask 523264   ;;  %v501_v20 = vld [vmem:[%s2680_s23 + $0x10] sm:$0xff]  ;;  %v2494_v5 = vmov 0   ;;  %vm1077_vm3 = vcmask 7168  }
  0x60   : > { %v2075_v21 = vpack.c.bf16 %v500_v19, %v499_v18  ;;  %vm2729_vm2 = vmpackc.low %vm515_vm1, %vm515_vm1  ;;  %v502_v23 = vld [vmem:[%s2680_s23 + $0x18] sm:$0xff]  ;;  %v483_v25 = vld [vmem:[%s2675_s18] sm:$0xff]  ;;  %2264 = vset.pattern.permute.xlu0 %v2494_v5  ;;  %2265 = vset.pattern.permute.xlu1 %v2494_v5  ;;  %p1891_p8 = scmp.ne.s32.totalorder %s2466_s20, 1 }
  0x61   : > { %v2081_v24 = vpack.c.bf16 %v502_v23, %v501_v20  ;;  %v503_v26 = vld [vmem:[%s2680_s23 + $0x20] sm:$0xff]  ;;  %v504_v27 = vld [vmem:[%s2680_s23 + $0x28] sm:$0xff]  ;;  %1995 = vmatprep.mubr.msk.f32.mxu0 %vm515_vm1, %v483_v25  ;;  %v505_v29 = vld [vmem:[%s2680_s23 + $0x30] sm:$0xff] }
  0x62   : > { %2077 = vmatprep.subr.msk.bf16.mxu0 %vm2729_vm2, %v2075_v21  ;;  %v2087_v28 = vpack.c.bf16 %v504_v27, %v503_v26  ;;  %v506_v30 = vld [vmem:[%s2680_s23 + $0x38] sm:$0xff]  ;;  %v507_v32 = vld [vmem:[%s2680_s23 + $0x40] sm:$0xff]  ;;  %v508_v33 = vld [vmem:[%s2680_s23 + $0x48] sm:$0xff] }
  0x63   : > { %2080 = vmatpush3.bf16.xpose.msk.msra.mxu0 %vm2729_vm2, %v2075_v21  ;;  %v2093_v31 = vpack.c.bf16 %v506_v30, %v505_v29  ;;  %v2099_v34 = vpack.c.bf16 %v508_v33, %v507_v32  ;;  %v509_v35 = vld [vmem:[%s2680_s23 + $0x50] sm:$0xff]  ;;  %v510_v36 = vld [vmem:[%s2680_s23 + $0x58] sm:$0xff]  ;;  %v511_v38 = vld [vmem:[%s2680_s23 + $0x60] sm:$0xff] }
  0x64   : > { %2083 = vmatprep.subr.msk.bf16.mxu0 %vm2729_vm2, %v2081_v24  ;;  %v2105_v37 = vpack.c.bf16 %v510_v36, %v509_v35  ;;  %v512_v39 = vld [vmem:[%s2680_s23 + $0x68] sm:$0xff]  ;;  %v513_v41 = vld [vmem:[%s2680_s23 + $0x70] sm:$0xff]  ;;  %v514_v42 = vld [vmem:[%s2680_s23 + $0x78] sm:$0xff] }
  0x65   : > { %v2111_v40 = vpack.c.bf16 %v512_v39, %v511_v38  ;;  %v2117_v43 = vpack.c.bf16 %v514_v42, %v513_v41  ;;  %v484_v44 = vld [vmem:[%s2675_s18 + $0x8] sm:$0xff]  ;;  %v485_v45 = vld [vmem:[%s2675_s18 + $0x10] sm:$0xff]  ;;  %v486_v46 = vld [vmem:[%s2675_s18 + $0x18] sm:$0xff] }
  0x66   : > { %v487_v47 = vld [vmem:[%s2675_s18 + $0x20] sm:$0xff]  ;;  %v488_v48 = vld [vmem:[%s2675_s18 + $0x28] sm:$0xff]  ;;  %v489_v49 = vld [vmem:[%s2675_s18 + $0x30] sm:$0xff] }
  0x67   : > { %v490_v50 = vld [vmem:[%s2675_s18 + $0x38] sm:$0xff]  ;;  %v491_v51 = vld [vmem:[%s2675_s18 + $0x40] sm:$0xff]  ;;  %v492_v52 = vld [vmem:[%s2675_s18 + $0x48] sm:$0xff] }
  0x68   : > { %v493_v53 = vld [vmem:[%s2675_s18 + $0x50] sm:$0xff]  ;;  %v494_v54 = vld [vmem:[%s2675_s18 + $0x58] sm:$0xff]  ;;  %v495_v55 = vld [vmem:[%s2675_s18 + $0x60] sm:$0xff] }
  0x69   : > { %v496_v56 = vld [vmem:[%s2675_s18 + $0x68] sm:$0xff]  ;;  %v497_v57 = vld [vmem:[%s2675_s18 + $0x70] sm:$0xff]  ;;  %v498_v58 = vld [vmem:[%s2675_s18 + $0x78] sm:$0xff] }
  0x6a   : > { %v1142_v12 = vld [vmem:[%s2685_s13] sm:$0xff]  ;;  %v1143_v13 = vld [vmem:[%s2685_s13 + $0x8] sm:$0xff]  ;;  %v1144_v14 = vld [vmem:[%s2685_s13 + $0x10] sm:$0xff] }
  0x6b   : > { %2086 = vmatpush3.bf16.xpose.msk.msra.mxu0 %vm2729_vm2, %v2081_v24  ;;  %v2123_v15 = vpack.c.bf16 %v1143_v13, %v1142_v12  ;;  %v1145_v16 = vld [vmem:[%s2685_s13 + $0x18] sm:$0xff]  ;;  %v1146_v18 = vld [vmem:[%s2685_s13 + $0x20] sm:$0xff]  ;;  %v1147_v19 = vld [vmem:[%s2685_s13 + $0x28] sm:$0xff] }
  0x6c   : > { %2089 = vmatprep.subr.msk.bf16.mxu0 %vm2729_vm2, %v2087_v28  ;;  %v2127_v17 = vpack.c.bf16 %v1145_v16, %v1144_v14  ;;  %v2131_v20 = vpack.c.bf16 %v1147_v19, %v1146_v18  ;;  %v1148_v21 = vld [vmem:[%s2685_s13 + $0x30] sm:$0xff]  ;;  %v1149_v22 = vld [vmem:[%s2685_s13 + $0x38] sm:$0xff]  ;;  %v2866_v24 = vld [vmem:[#allocation2] sm:$0xff] }
  0x6d   : > { %2124 = vmatprep.subr.bf16.mxu1 %v2123_v15  ;;  %v2135_v23 = vpack.c.bf16 %v1149_v22, %v1148_v21  ;;  %v2871_v27 = vld [vmem:[#allocation2 + $0x18] sm:$0xff]  ;;  %v1150_v30 = vld [vmem:[%s2685_s13 + $0x40] sm:$0xff]  ;;  %v2886_v36 = vld [vmem:[#allocation2 + $0x10] sm:$0xff] }
  0x6e   : > { %2126 = vmatpush3.bf16.msra.mxu1 %v2123_v15  ;;  %v1152_v39 = vld [vmem:[%s2685_s13 + $0x50] sm:$0xff]  ;;  %v766_v14 = vld [vmem:[#allocation2 + $0x48] sm:$0xff]  ;;  %v768_v21 = vld [vmem:[#allocation2 + $0x58] sm:$0xff] }
  0x6f   : > { %2128 = vmatprep.subr.bf16.mxu1 %v2127_v17  ;;  %v2933_v16 = vld [vmem:[#allocation2 + $0x50] sm:$0xff] }
  0x72   : > { %2130 = vmatpush3.bf16.msra.mxu1 %v2127_v17 }
  0x73   : > { %2092 = vmatpush3.bf16.xpose.msk.msra.mxu0 %vm2729_vm2, %v2087_v28  ;;  %2132 = vmatprep.subr.bf16.mxu1 %v2131_v20  ;;  %v2873_v28 = vld [vmem:[#allocation2 + $0x8] sm:$0xff] }
  0x74   : > { %2095 = vmatprep.subr.msk.bf16.mxu0 %vm2729_vm2, %v2093_v31 }
  0x76   : > { %2134 = vmatpush3.bf16.msra.mxu1 %v2131_v20 }
  0x77   : > { %2136 = vmatprep.subr.bf16.mxu1 %v2135_v23 }
  0x7a   : > { %2138 = vmatpush3.bf16.msra.mxu1 %v2135_v23  ;;  %v2943_v23 = vld [vmem:[#allocation2 + $0x60] sm:$0xff] }
  0x7b   : > { %2098 = vmatpush3.bf16.xpose.msk.msra.mxu0 %vm2729_vm2, %v2093_v31  ;;  %v1151_v31 = vld [vmem:[%s2685_s13 + $0x48] sm:$0xff] }
  0x7c   : > { %2101 = vmatprep.subr.msk.bf16.mxu0 %vm2729_vm2, %v2099_v34 }
  0x83   : > { %2104 = vmatpush3.bf16.xpose.msk.msra.mxu0 %vm2729_vm2, %v2099_v34  ;;  %v2139_v34 = vpack.c.bf16 %v1151_v31, %v1150_v30  ;;  %v770_v31 = vld [vmem:[#allocation2 + $0x68] sm:$0xff] }
  0x84   : > { %2107 = vmatprep.subr.msk.bf16.mxu0 %vm2729_vm2, %v2105_v37 }
  0x85   : > { %2140 = vmatprep.subr.bf16.mxu1 %v2139_v34 }
  0x86   : > { %2142 = vmatpush3.bf16.msra.mxu1 %v2139_v34  ;;  %v2954_v34 = vld [vmem:[#allocation2 + $0x70] sm:$0xff] }
  0x8b   : > { %2110 = vmatpush3.bf16.xpose.msk.msra.mxu0 %vm2729_vm2, %v2105_v37  ;;  %v2890_v37 = vld [vmem:[#allocation2 + $0x20] sm:$0xff] }
  0x8c   : > { %2113 = vmatprep.subr.msk.bf16.mxu0 %vm2729_vm2, %v2111_v40 }
  0x93   : > { %2116 = vmatpush3.bf16.xpose.msk.msra.mxu0 %vm2729_vm2, %v2111_v40  ;;  %v1153_v40 = vld [vmem:[%s2685_s13 + $0x58] sm:$0xff] }
  0x94   : > { %2119 = vmatprep.subr.msk.bf16.mxu0 %vm2729_vm2, %v2117_v43 }
  0x9b   : > { %2122 = vmatpush3.bf16.xpose.msk.msra.mxu0 %vm2729_vm2, %v2117_v43  ;;  %v2143_v43 = vpack.c.bf16 %v1153_v40, %v1152_v39 }
  0x9d   : > { %2144 = vmatprep.subr.bf16.mxu1 %v2143_v43 }
  0x9e   : > { %2146 = vmatpush3.bf16.msra.mxu1 %v2143_v43 }
  0xa2   : > { %1996 = vmatmul.mubr.msk.f32.vlgmr.msra.gmra.mrb[0].mxu0 %vm515_vm1, %v484_v44  ;;  %v2900_v44 = vld [vmem:[#allocation2 + $0x28] sm:$0xff] }
  0xa3   : > { %1998 = vmatprep.mubr.msk.f32.mxu0 %vm515_vm1, %v485_v45 }
  0xa6   : > { %1999 = vmatmul.mubr.msk.f32.gmra.mrb[2].mxu0 %vm515_vm1, %v486_v46  ;;  %v2907_v46 = vld [vmem:[#allocation2 + $0x30] sm:$0xff] }
  0xa7   : > { %2001 = vmatprep.mubr.msk.f32.mxu0 %vm515_vm1, %v487_v47 }
  0xaa   : > { %2002 = vmatmul.mubr.msk.f32.gmra.mrb[4].mxu0 %vm515_vm1, %v488_v48  ;;  %v1154_v48 = vld [vmem:[%s2685_s13 + $0x60] sm:$0xff] }
  0xab   : > { %2004 = vmatprep.mubr.msk.f32.mxu0 %vm515_vm1, %v489_v49  ;;  %v1155_v49 = vld [vmem:[%s2685_s13 + $0x68] sm:$0xff] }
  0xae   : > { %2005 = vmatmul.mubr.msk.f32.gmra.mrb[6].mxu0 %vm515_vm1, %v490_v50 }
  0xaf   : > { %2007 = vmatprep.mubr.msk.f32.mxu0 %vm515_vm1, %v491_v51 }
  0xb2   : > { %2008 = vmatmul.mubr.msk.f32.gmra.mrb[8].mxu0 %vm515_vm1, %v492_v52  ;;  %v2147_v52 = vpack.c.bf16 %v1155_v49, %v1154_v48 }
  0xb3   : > { %2010 = vmatprep.mubr.msk.f32.mxu0 %vm515_vm1, %v493_v53  ;;  %v2915_v53 = vld [vmem:[#allocation2 + $0x38] sm:$0xff] }
  0xb4   : > { %2148 = vmatprep.subr.bf16.mxu1 %v2147_v52 }
  0xb5   : > { %2150 = vmatpush3.bf16.msra.mxu1 %v2147_v52 }
  0xb6   : > { %2011 = vmatmul.mubr.msk.f32.gmra.mrb[10].mxu0 %vm515_vm1, %v494_v54 }
  0xb7   : > { %2013 = vmatprep.mubr.msk.f32.mxu0 %vm515_vm1, %v495_v55  ;;  %v2921_v55 = vld [vmem:[#allocation2 + $0x40] sm:$0xff] }
  0xba   : > { %2014 = vmatmul.mubr.msk.f32.gmra.mrb[12].mxu0 %vm515_vm1, %v496_v56 }
  0xbb   : > { %2016 = vmatprep.mubr.msk.f32.mxu0 %vm515_vm1, %v497_v57  ;;  %v1156_v57 = vld [vmem:[%s2685_s13 + $0x70] sm:$0xff] }
  0xbe   : > { %2017 = vmatmul.mubr.msk.f32.gmra.mrb[14].mxu0 %vm515_vm1, %v498_v58  ;;  %v1157_v58 = vld [vmem:[%s2685_s13 + $0x78] sm:$0xff] }
  0xbf   : > { %v2151_v13 = vpack.c.bf16 %v1157_v58, %v1156_v57 }
  0xc1   : > { %2152 = vmatprep.subr.bf16.mxu1 %v2151_v13 }
  0xc2   : > { %2154 = vmatpush3.bf16.msra.mxu1 %v2151_v13 }
 0x175   : > { %v2810_v59 = vpop.f32.mrb[0].mxu0 }
 0x176   : > { %v2812_v60 = vpop.f32.mrb[1].mxu0 }
 0x177   : > { %773 = vmax.xlane.f32.xlu0 %v2812_v60 }
 0x179   : > { %v2815_v61 = vpop.f32.mrb[2].mxu0 }
 0x17a   : > { %779 = vmax.xlane.f32.xlu1 %v2815_v61  ;;  %v2818_v62 = vpop.f32.mrb[3].mxu0 }
 0x17b   : > { %775 = vmax.xlane.f32.xlu0 %v2810_v59 }
 0x17d   : > { %v2821_v63 = vpop.f32.mrb[4].mxu0 }
 0x17e   : > { %777 = vmax.xlane.f32.xlu1 %v2818_v62  ;;  %v2824_v0 = vpop.f32.mrb[5].mxu0 }
 0x17f   : > { %781 = vmax.xlane.f32.xlu0 %v2824_v0 }
 0x181   : > { %v2827_v1 = vpop.f32.mrb[6].mxu0 }
 0x182   : > { %783 = vmax.xlane.f32.xlu1 %v2821_v63  ;;  %v2830_v2 = vpop.f32.mrb[7].mxu0 }
 0x183   : > { %785 = vmax.xlane.f32.xlu0 %v2830_v2 }
 0x185   : > { %v2833_v3 = vpop.f32.mrb[8].mxu0 }
 0x186   : > { %787 = vmax.xlane.f32.xlu1 %v2827_v1  ;;  %v2836_v4 = vpop.f32.mrb[9].mxu0 }
 0x187   : > { %789 = vmax.xlane.f32.xlu0 %v2836_v4 }
 0x189   : > { %v2839_v6 = vpop.f32.mrb[10].mxu0 }
 0x18a   : > { %791 = vmax.xlane.f32.xlu1 %v2833_v3  ;;  %v2842_v7 = vpop.f32.mrb[11].mxu0 }
 0x18b   : > { %793 = vmax.xlane.f32.xlu0 %v2842_v7 }
 0x18d   : > { %v2845_v8 = vpop.f32.mrb[12].mxu0 }
 0x18e   : > { %795 = vmax.xlane.f32.xlu1 %v2839_v6  ;;  %v2848_v9 = vpop.f32.mrb[13].mxu0 }
 0x18f   : > { %797 = vmax.xlane.f32.xlu0 %v2848_v9 }
 0x191   : > { %v2851_v10 = vpop.f32.mrb[14].mxu0 }
 0x192   : > { %799 = vmax.xlane.f32.xlu1 %v2845_v8  ;;  %v2854_v11 = vpop.f32.mrb[15].mxu0 }
 0x193   : > { %801 = vmax.xlane.f32.xlu0 %v2854_v11 }
 0x196   : > { %803 = vmax.xlane.f32.xlu1 %v2851_v10 }
 0x204   : > { %v774_v25 = vpop.xlane.xlu0 %773 }
 0x205   : > { %v2869_v26 = vmax.f32 %v2866_v24, %v774_v25 }
 0x207   : > { %1447 = vst.msk [vmem:[#allocation2] sm:$0xff] %vm1077_vm3, %v2869_v26  ;;  %v780_v29 = vpop.xlane.xlu1 %779  ;;  %871 = vperm.xlu0 %2264, %v2869_v26   ;;  %v821_v17 = vsub.f32 %v2866_v24, %v2869_v26 }
 0x208   : > { %v2881_v32 = vmax.f32 %v2871_v27, %v780_v29  ;;  %v776_v33 = vpop.xlane.xlu0 %775 }
 0x209   : > { %v2884_v35 = vmax.f32 %v2873_v28, %v776_v33  ;;  %v837_v25 = vmul.f32 1.442695, %v821_v17 }
 0x20a   : > { %1450 = vst.msk [vmem:[#allocation2 + $0x18] sm:$0xff] %vm1077_vm3, %v2881_v32  ;;  %v824_v24 = vsub.f32 %v2871_v27, %v2881_v32 }
 0x20b   : > { %1448 = vst.msk [vmem:[#allocation2 + $0x8] sm:$0xff] %vm1077_vm3, %v2884_v35  ;;  %v778_v38 = vpop.xlane.xlu1 %777  ;;  %876 = vperm.xlu1 %2265, %v2884_v35   ;;  %2266 = vpow2.f32 %v837_v25 }
 0x20c   : > { %v2898_v41 = vmax.f32 %v2886_v36, %v778_v38  ;;  %v782_v42 = vpop.xlane.xlu0 %781  ;;  %v843_v38 = vmul.f32 1.442695, %v824_v24 }
 0x20d   : > { %v2903_v45 = vmax.f32 %v2890_v37, %v782_v42  ;;  %v2959_v42 = vld [vmem:[#allocation2 + $0x78] sm:$0xff] }
 0x20e   : > { %1449 = vst.msk [vmem:[#allocation2 + $0x10] sm:$0xff] %vm1077_vm3, %v2898_v41  ;;  %2268 = vpow2.f32 %v843_v38 }
 0x20f   : > { %v784_v47 = vpop.xlane.xlu1 %783  ;;  %886 = vperm.xlu1 %2265, %v2881_v32   ;;  %1451 = vst.msk [vmem:[#allocation2 + $0x20] sm:$0xff] %vm1077_vm3, %v2903_v45  ;;  %v825_v13 = vsub.f32 %v2890_v37, %v2903_v45 }
 0x210   : > { %v810_v50 = vmax.f32 %v2900_v44, %v784_v47  ;;  %v786_v51 = vpop.xlane.xlu0 %785 }
 0x211   : > { %v2918_v54 = vmax.f32 %v2907_v46, %v786_v51  ;;  %v845_v17 = vmul.f32 1.442695, %v825_v13 }
 0x212   : > { %1452 = vst.msk [vmem:[#allocation2 + $0x28] sm:$0xff] %vm1077_vm3, %v810_v50  ;;  %v826_v27 = vsub.f32 %v2900_v44, %v810_v50 }
 0x213   : > { %v788_v56 = vpop.xlane.xlu1 %787  ;;  %881 = vperm.xlu1 %2265, %v2898_v41   ;;  %1453 = vst.msk [vmem:[#allocation2 + $0x30] sm:$0xff] %vm1077_vm3, %v2918_v54 }
 0x214   : > { %v812_v5 = vmax.f32 %v2915_v53, %v788_v56  ;;  %v790_v12 = vpop.xlane.xlu0 %789  ;;  %v847_v47 = vmul.f32 1.442695, %v826_v27 }
 0x215   : > { %v2930_v15 = vmax.f32 %v2921_v55, %v790_v12 }
 0x216   : > { %1454 = vst.msk [vmem:[#allocation2 + $0x38] sm:$0xff] %vm1077_vm3, %v812_v5  ;;  %v828_v48 = vsub.f32 %v2915_v53, %v812_v5  ;;  %2270 = vpow2.f32 %v847_v47 }
 0x217   : > { %v792_v18 = vpop.xlane.xlu1 %791  ;;  %896 = vperm.xlu1 %2265, %v810_v50   ;;  %1455 = vst.msk [vmem:[#allocation2 + $0x40] sm:$0xff] %vm1077_vm3, %v2930_v15  ;;  %v822_v50 = vsub.f32 %v2873_v28, %v2884_v35  ;;  %v823_v28 = vsub.f32 %v2886_v36, %v2898_v41  ;;  %v2984_v35 = vpop.eup %2266 }
 0x218   : > { %v814_v19 = vmax.f32 %v766_v14, %v792_v18  ;;  %v794_v20 = vpop.xlane.xlu0 %793  ;;  %v851_v53 = vmul.f32 1.442695, %v828_v48  ;;  %v827_v18 = vsub.f32 %v2907_v46, %v2918_v54 }
 0x219   : > { %v2940_v22 = vmax.f32 %v2933_v16, %v794_v20  ;;  %v839_v57 = vmul.f32 1.442695, %v822_v50  ;;  %v841_v12 = vmul.f32 1.442695, %v823_v28  ;;  %v829_v20 = vsub.f32 %v2921_v55, %v2930_v15 }
 0x21a   : > { %1456 = vst.msk [vmem:[#allocation2 + $0x48] sm:$0xff] %vm1077_vm3, %v814_v19  ;;  %916 = vperm.xlu0 %2264, %v814_v19   ;;  %v830_v56 = vsub.f32 %v766_v14, %v814_v19  ;;  %2272 = vpow2.f32 %v851_v53  ;;  %v2990_v14 = vpop.eup %2268  ;;  %v1094_v53 = vld [vmem:[%s2687_s29] sm:$0xff] }
 0x21b   : > { %v796_v26 = vpop.xlane.xlu1 %795  ;;  %891 = vperm.xlu1 %2265, %v2903_v45   ;;  %1457 = vst.msk [vmem:[#allocation2 + $0x50] sm:$0xff] %vm1077_vm3, %v2940_v22  ;;  %2274 = vpow2.f32 %v839_v57  ;;  %v849_v45 = vmul.f32 1.442695, %v827_v18  ;;  %v853_v46 = vmul.f32 1.442695, %v829_v20  ;;  %v1097_v20 = vld [vmem:[%s2687_s29 + $0x18] sm:$0xff] }
 0x21c   : > { %v816_v29 = vmax.f32 %v768_v21, %v796_v26  ;;  %v798_v30 = vpop.xlane.xlu0 %797  ;;  %v855_v58 = vmul.f32 1.442695, %v830_v56  ;;  %vm1110_vm4 = vcmp.ge.u32.totalorder %v1094_v53, 1288490189  ;;  %vm1113_vm7 = vcmp.ge.u32.totalorder %v1097_v20, 1288490189 }
 0x21d   : > { %v2951_v33 = vmax.f32 %v2943_v23, %v798_v30  ;;  %v1105_v20 = vld [vmem:[%s2687_s29 + $0x58] sm:$0xff] }
 0x21e   : > { %1458 = vst.msk [vmem:[#allocation2 + $0x58] sm:$0xff] %vm1077_vm3, %v816_v29  ;;  %926 = vperm.xlu0 %2264, %v816_v29   ;;  %2276 = vpow2.f32 %v855_v58  ;;  %v1095_v58 = vld [vmem:[%s2687_s29 + $0x8] sm:$0xff]  ;;  %vm1121_vm15 = vcmp.ge.u32.totalorder %v1105_v20, 1288490189 }
 0x21f   : > { %v800_v32 = vpop.xlane.xlu1 %799  ;;  %906 = vperm.xlu1 %2265, %v812_v5   ;;  %1459 = vst.msk [vmem:[#allocation2 + $0x60] sm:$0xff] %vm1077_vm3, %v2951_v33  ;;  %v832_v5 = vsub.f32 %v768_v21, %v816_v29  ;;  %2278 = vpow2.f32 %v841_v12  ;;  %vm1111_vm5 = vcmp.ge.u32.totalorder %v1095_v58, 1288490189 }
 0x220   : > { %v818_v39 = vmax.f32 %v770_v31, %v800_v32  ;;  %v802_v40 = vpop.xlane.xlu0 %801  ;;  %v2996_v19 = vpop.eup %2270 }
 0x221   : > { %v2962_v43 = vmax.f32 %v2954_v34, %v802_v40  ;;  %v859_v36 = vmul.f32 1.442695, %v832_v5 }
 0x222   : > { %1460 = vst.msk [vmem:[#allocation2 + $0x68] sm:$0xff] %vm1077_vm3, %v818_v39  ;;  %936 = vperm.xlu0 %2264, %v818_v39   ;;  %v834_v41 = vsub.f32 %v770_v31, %v818_v39 }
 0x223   : > { %901 = vperm.xlu1 %2265, %v2918_v54   ;;  %v804_v44 = vpop.xlane.xlu1 %803  ;;  %v835_v49 = vsub.f32 %v2954_v34, %v2962_v43  ;;  %1461 = vst.msk [vmem:[#allocation2 + $0x70] sm:$0xff] %vm1077_vm3, %v2962_v43  ;;  %2280 = vpow2.f32 %v859_v36  ;;  %v831_v54 = vsub.f32 %v2933_v16, %v2940_v22 }
 0x224   : > { %v2974_v51 = vmax.f32 %v2959_v42, %v804_v44  ;;  %v863_v37 = vmul.f32 1.442695, %v834_v41  ;;  %2282 = vpow2.f32 %v845_v17  ;;  %v3002_v21 = vpop.eup %2272  ;;  %v1096_v17 = vld [vmem:[%s2687_s29 + $0x10] sm:$0xff] }
 0x225   : > { %v3004_v25 = vpop.eup %2274  ;;  %v857_v55 = vmul.f32 1.442695, %v831_v54  ;;  %vm1112_vm6 = vcmp.ge.u32.totalorder %v1096_v17, 1288490189 }
 0x226   : > { %v836_v52 = vsub.f32 %v2959_v42, %v2974_v51  ;;  %1462 = vst.msk [vmem:[#allocation2 + $0x78] sm:$0xff] %vm1077_vm3, %v2974_v51  ;;  %946 = vperm.xlu0 %2264, %v2974_v51   ;;  %2284 = vpow2.f32 %v863_v37 }
 0x227   : > { %911 = vperm.xlu1 %2265, %v2930_v15   ;;  %2286 = vpow2.f32 %v849_v45  ;;  %v833_v15 = vsub.f32 %v2943_v23, %v2951_v33 }
 0x228   : > { %v3010_v24 = vpop.eup %2276  ;;  %2288 = vpow2.f32 %v853_v46 }
 0x229   : > { %v3012_v26 = vpop.eup %2278  ;;  %2290 = vpow2.f32 %v857_v55  ;;  %v861_v16 = vmul.f32 1.442695, %v833_v15 }
 0x22a   : > { %1321 = vperm.xlu0 %2264, %v2984_v35  }
 0x22b   : > { %921 = vperm.xlu1 %2265, %v2940_v22   ;;  %2292 = vpow2.f32 %v861_v16 }
 0x22d   : > { %v3018_v29 = vpop.eup %2280 }
 0x22e   : > { %1336 = vperm.xlu0 %2264, %v2990_v14   ;;  %v3020_v30 = vpop.eup %2282 }
 0x22f   : > { %931 = vperm.xlu1 %2265, %v2951_v33  }
 0x230   : > { %v3024_v22 = vpop.eup %2284 }
 0x231   : > { %v3026_v31 = vpop.eup %2286 }
 0x232   : > { %1346 = vperm.xlu0 %2264, %v2996_v19   ;;  %v3030_v23 = vpop.eup %2288 }
 0x233   : > { %941 = vperm.xlu1 %2265, %v2962_v43   ;;  %v3033_v33 = vpop.eup %2290 }
 0x235   : > { %v3036_v38 = vpop.eup %2292 }
 0x236   : > { %1356 = vperm.xlu0 %2264, %v3002_v21  }
 0x237   : > { %1326 = vperm.xlu1 %2265, %v3004_v25  }
 0x23a   : > { %1366 = vperm.xlu0 %2264, %v3010_v24  }
 0x23b   : > { %1331 = vperm.xlu1 %2265, %v3012_v26  }
 0x23e   : > { %1376 = vperm.xlu0 %2264, %v3018_v29  }
 0x23f   : > { %1341 = vperm.xlu1 %2265, %v3020_v30  }
 0x242   : > { %1386 = vperm.xlu0 %2264, %v3024_v22  }
 0x243   : > { %1351 = vperm.xlu1 %2265, %v3026_v31  }
 0x247   : > { %1361 = vperm.xlu1 %2265, %v3030_v23  }
 0x24b   : > { %1371 = vperm.xlu1 %2265, %v3033_v33  }
 0x24f   : > { %1381 = vperm.xlu1 %2265, %v3036_v38  }
 0x286   : > { %v872_v27 = vpop.permute.xlu0 %871 }
 0x287   : > { %v949_v32 = vsub.f32 %v2812_v60, %v872_v27 }
 0x289   : > { %v965_v39 = vmul.f32 1.442695, %v949_v32 }
 0x28a   : > { %v877_v40 = vpop.permute.xlu1 %876 }
 0x28b   : > { %2294 = vpow2.f32 %v965_v39  ;;  %v950_v47 = vsub.f32 %v2810_v59, %v877_v40  ;;  %v1098_v40 = vld [vmem:[%s2687_s29 + $0x20] sm:$0xff] }
 0x28c   : > { %vm1114_vm8 = vcmp.ge.u32.totalorder %v1098_v40, 1288490189  ;;  %v867_v40 = vmul.f32 1.442695, %v836_v52 }
 0x28d   : > { %v967_v48 = vmul.f32 1.442695, %v950_v47 }
 0x28e   : > { %v887_v44 = vpop.permute.xlu1 %886 }
 0x28f   : > { %2296 = vpow2.f32 %v967_v48  ;;  %v952_v50 = vsub.f32 %v2815_v61, %v887_v44  ;;  %v1099_v48 = vld [vmem:[%s2687_s29 + $0x28] sm:$0xff] }
 0x290   : > { %vm1115_vm9 = vcmp.ge.u32.totalorder %v1099_v48, 1288490189 }
 0x291   : > { %v971_v56 = vmul.f32 1.442695, %v952_v50 }
 0x292   : > { %v882_v57 = vpop.permute.xlu1 %881 }
 0x293   : > { %2298 = vpow2.f32 %v971_v56  ;;  %v951_v28 = vsub.f32 %v2818_v62, %v882_v57 }
 0x295   : > { %v2295_v5 = vpop.eup %2294  ;;  %v969_v60 = vmul.f32 1.442695, %v951_v28 }
 0x296   : > { %v897_v12 = vpop.permute.xlu1 %896  ;;  %1029 = vadd.xlane.f32.xlu1 %v2295_v5  ;;  %2051 = vmatprep.mubr.msk.f32.mxu1 %vm1110_vm4, %v2295_v5  ;;  %v1100_v5 = vld [vmem:[%s2687_s29 + $0x30] sm:$0xff] }
 0x297   : > { %2300 = vpow2.f32 %v969_v60  ;;  %v954_v59 = vsub.f32 %v2821_v63, %v897_v12  ;;  %v1101_v12 = vld [vmem:[%s2687_s29 + $0x38] sm:$0xff]  ;;  %vm1116_vm10 = vcmp.ge.u32.totalorder %v1100_v5, 1288490189 }
 0x298   : > { %vm1117_vm11 = vcmp.ge.u32.totalorder %v1101_v12, 1288490189  ;;  %v1000_v12 = vld [vmem:[#allocation3 + $0x18] sm:$0xff] }
 0x299   : > { %v2297_v61 = vpop.eup %2296  ;;  %v975_v13 = vmul.f32 1.442695, %v954_v59  ;;  %v917_v36 = vpop.permute.xlu0 %916 }
 0x29a   : > { %v892_v41 = vpop.permute.xlu1 %891  ;;  %1031 = vadd.xlane.f32.xlu0 %v2297_v61  ;;  %2052 = vmatmul.mubr.msk.f32.vlgmr.msra.gmra.mrb[0].mxu1 %vm1111_vm5, %v2297_v61  ;;  %v958_v54 = vsub.f32 %v2833_v3, %v917_v36 }
 0x29b   : > { %2302 = vpow2.f32 %v975_v13  ;;  %v953_v62 = vsub.f32 %v2824_v0, %v892_v41 }
 0x29c   : > { %v983_v32 = vmul.f32 1.442695, %v958_v54  ;;  %v1107_v54 = vld [vmem:[%s2687_s29 + $0x68] sm:$0xff] }
 0x29d   : > { %v2299_v18 = vpop.eup %2298  ;;  %v973_v37 = vmul.f32 1.442695, %v953_v62  ;;  %v927_v45 = vpop.permute.xlu0 %926  ;;  %vm1123_vm1 = vcmp.ge.u32.totalorder %v1107_v54, 1288490189  ;;  %v1006_v54 = vld [vmem:[#allocation3 + $0x48] sm:$0xff] }
 0x29e   : > { %v907_v46 = vpop.permute.xlu1 %906  ;;  %1035 = vadd.xlane.f32.xlu1 %v2299_v18  ;;  %v960_v39 = vsub.f32 %v2839_v6, %v927_v45 }
 0x29f   : > { %2304 = vpow2.f32 %v973_v37  ;;  %v956_v63 = vsub.f32 %v2827_v1, %v907_v46 }
 0x2a0   : > { %v987_v50 = vmul.f32 1.442695, %v960_v39  ;;  %v865_v39 = vmul.f32 1.442695, %v835_v49 }
 0x2a1   : > { %v2301_v55 = vpop.eup %2300  ;;  %v979_v15 = vmul.f32 1.442695, %v956_v63  ;;  %v937_v0 = vpop.permute.xlu0 %936 }
 0x2a2   : > { %v902_v16 = vpop.permute.xlu1 %901  ;;  %1033 = vadd.xlane.f32.xlu0 %v2301_v55  ;;  %2054 = vmatprep.mubr.msk.f32.mxu1 %vm1112_vm6, %v2301_v55  ;;  %v962_v53 = vsub.f32 %v2845_v8, %v937_v0  ;;  %v1109_v0 = vld [vmem:[%s2687_s29 + $0x78] sm:$0xff] }
 0x2a3   : > { %2306 = vpow2.f32 %v979_v15  ;;  %v955_v27 = vsub.f32 %v2830_v2, %v902_v16  ;;  %2055 = vmatmul.mubr.msk.f32.gmra.mrb[2].mxu1 %vm1113_vm7, %v2299_v18  ;;  %v1108_v15 = vld [vmem:[%s2687_s29 + $0x70] sm:$0xff]  ;;  %vm1125_vm4 = vcmp.ge.u32.totalorder %v1109_v0, 1288490189 }
 0x2a4   : > { %vm1124_vm2 = vcmp.ge.u32.totalorder %v1108_v15, 1288490189 }
 0x2a5   : > { %v2303_v1 = vpop.eup %2302  ;;  %v977_v47 = vmul.f32 1.442695, %v955_v27  ;;  %v947_v56 = vpop.permute.xlu0 %946 }
 0x2a6   : > { %v912_v3 = vpop.permute.xlu1 %911  ;;  %1039 = vadd.xlane.f32.xlu1 %v2303_v1  ;;  %v964_v58 = vsub.f32 %v2851_v10, %v947_v56  ;;  %v1103_v10 = vld [vmem:[%s2687_s29 + $0x48] sm:$0xff] }
 0x2a7   : > { %2308 = vpow2.f32 %v977_v47  ;;  %v957_v44 = vsub.f32 %v2836_v4, %v912_v3  ;;  %v991_v4 = vmul.f32 1.442695, %v962_v53  ;;  %vm1119_vm13 = vcmp.ge.u32.totalorder %v1103_v10, 1288490189  ;;  %v1002_v10 = vld [vmem:[#allocation3 + $0x28] sm:$0xff] }
 0x2a8   : > { %2310 = vpow2.f32 %v983_v32  ;;  %v995_v13 = vmul.f32 1.442695, %v964_v58  ;;  %v998_v58 = vld [vmem:[#allocation3 + $0x8] sm:$0xff] }
 0x2a9   : > { %v2305_v2 = vpop.eup %2304  ;;  %v981_v6 = vmul.f32 1.442695, %v957_v44  ;;  %v3085_v34 = vpop.permute.xlu0 %1321 }
 0x2aa   : > { %v922_v57 = vpop.permute.xlu1 %921  ;;  %1037 = vadd.xlane.f32.xlu0 %v2305_v2  ;;  %2057 = vmatprep.mubr.msk.f32.mxu1 %vm1114_vm8, %v2305_v2 }
 0x2ab   : > { %2312 = vpow2.f32 %v981_v6  ;;  %v959_v28 = vsub.f32 %v2842_v7, %v922_v57  ;;  %2058 = vmatmul.mubr.msk.f32.gmra.mrb[4].mxu1 %vm1115_vm9, %v2303_v1  ;;  %v1102_v7 = vld [vmem:[%s2687_s29 + $0x40] sm:$0xff] }
 0x2ac   : > { %2314 = vpow2.f32 %v987_v50  ;;  %vm1118_vm12 = vcmp.ge.u32.totalorder %v1102_v7, 1288490189  ;;  %v997_v6 = vld [vmem:[#allocation3] sm:$0xff]  ;;  %v999_v7 = vld [vmem:[#allocation3 + $0x10] sm:$0xff] }
 0x2ad   : > { %v2307_v8 = vpop.eup %2306  ;;  %v985_v60 = vmul.f32 1.442695, %v959_v28  ;;  %v3089_v49 = vpop.permute.xlu0 %1336  ;;  %v1013_v57 = vmul.f32 %v2984_v35, %v997_v6  ;;  %v1015_v35 = vmul.f32 %v3012_v26, %v999_v7  ;;  %v1007_v6 = vld [vmem:[#allocation3 + $0x50] sm:$0xff] }
 0x2ae   : > { %v932_v59 = vpop.permute.xlu1 %931  ;;  %1043 = vadd.xlane.f32.xlu1 %v2307_v8 }
 0x2af   : > { %2316 = vpow2.f32 %v985_v60  ;;  %v961_v61 = vsub.f32 %v2848_v9, %v932_v59  ;;  %v1104_v9 = vld [vmem:[%s2687_s29 + $0x50] sm:$0xff] }
 0x2b0   : > { %2318 = vpow2.f32 %v991_v4  ;;  %vm1120_vm14 = vcmp.ge.u32.totalorder %v1104_v9, 1288490189 }
 0x2b1   : > { %v2309_v36 = vpop.eup %2308  ;;  %v989_v41 = vmul.f32 1.442695, %v961_v61  ;;  %v3093_v42 = vpop.permute.xlu0 %1346  ;;  %v1016_v61 = vmul.f32 %v2990_v14, %v1000_v12 }
 0x2b2   : > { %v2311_v62 = vpop.eup %2310  ;;  %1041 = vadd.xlane.f32.xlu0 %v2309_v36  ;;  %v942_v17 = vpop.permute.xlu1 %941  ;;  %2060 = vmatprep.mubr.msk.f32.mxu1 %vm1116_vm10, %v2309_v36 }
 0x2b3   : > { %2320 = vpow2.f32 %v989_v41  ;;  %v963_v18 = vsub.f32 %v2854_v11, %v942_v17  ;;  %1047 = vadd.xlane.f32.xlu1 %v2311_v62  ;;  %2061 = vmatmul.mubr.msk.f32.gmra.mrb[6].mxu1 %vm1117_vm11, %v2307_v8  ;;  %v1106_v11 = vld [vmem:[%s2687_s29 + $0x60] sm:$0xff]  ;;  %v1014_v8 = vmul.f32 %v3004_v25, %v998_v58  ;;  %v1018_v25 = vmul.f32 %v2996_v19, %v1002_v10 }
 0x2b4   : > { %2322 = vpow2.f32 %v995_v13  ;;  %vm1122_vm0 = vcmp.ge.u32.totalorder %v1106_v11, 1288490189  ;;  %v1003_v11 = vld [vmem:[#allocation3 + $0x30] sm:$0xff]  ;;  %v1023_v58 = vmul.f32 %v3033_v33, %v1007_v6 }
 0x2b5   : > { %v2313_v37 = vpop.eup %2312  ;;  %v993_v45 = vmul.f32 1.442695, %v963_v18  ;;  %v3097_v52 = vpop.permute.xlu0 %1356  ;;  %v1001_v18 = vld [vmem:[#allocation3 + $0x20] sm:$0xff]  ;;  %v1019_v19 = vmul.f32 %v3026_v31, %v1003_v11  ;;  %v1011_v33 = vld [vmem:[#allocation3 + $0x70] sm:$0xff] }
 0x2b6   : > { %v2315_v46 = vpop.eup %2314  ;;  %1045 = vadd.xlane.f32.xlu0 %v2313_v37  ;;  %2063 = vmatprep.mubr.msk.f32.mxu1 %vm1118_vm12, %v2313_v37  ;;  %v3083_v48 = vpop.permute.xlu1 %1326  ;;  %v1017_v14 = vmul.f32 %v3020_v30, %v1001_v18 }
 0x2b7   : > { %2324 = vpow2.f32 %v993_v45  ;;  %1051 = vadd.xlane.f32.xlu1 %v2315_v46  ;;  %2064 = vmatmul.mubr.msk.f32.gmra.mrb[8].mxu1 %vm1119_vm13, %v2311_v62  ;;  %v1004_v45 = vld [vmem:[#allocation3 + $0x38] sm:$0xff] }
 0x2b8   : > { %2326 = vpow2.f32 %v865_v39  ;;  %v1020_v26 = vmul.f32 %v3002_v21, %v1004_v45  ;;  %v1306_v45 = vld [vmem:[#allocation4 + $0x18] sm:$0xff] }
 0x2b9   : > { %v2317_v63 = vpop.eup %2316  ;;  %2328 = vpow2.f32 %v867_v40  ;;  %v3101_v50 = vpop.permute.xlu0 %1366 }
 0x2ba   : > { %v2319_v55 = vpop.eup %2318  ;;  %1049 = vadd.xlane.f32.xlu0 %v2317_v63  ;;  %2066 = vmatprep.mubr.msk.f32.mxu1 %vm1120_vm14, %v2317_v63  ;;  %v3087_v43 = vpop.permute.xlu1 %1331 }
 0x2bb   : > { %1055 = vadd.xlane.f32.xlu1 %v2319_v55  ;;  %2067 = vmatmul.mubr.msk.f32.gmra.mrb[10].mxu1 %vm1121_vm15, %v2315_v46 }
 0x2bd   : > { %v2321_v16 = vpop.eup %2320  ;;  %v3105_v2 = vpop.permute.xlu0 %1376 }
 0x2be   : > { %v2323_v27 = vpop.eup %2322  ;;  %1053 = vadd.xlane.f32.xlu0 %v2321_v16  ;;  %2069 = vmatprep.mubr.msk.f32.mxu1 %vm1122_vm0, %v2321_v16  ;;  %v3091_v3 = vpop.permute.xlu1 %1341  ;;  %v1005_v16 = vld [vmem:[#allocation3 + $0x40] sm:$0xff] }
 0x2bf   : > { %1059 = vadd.xlane.f32.xlu1 %v2323_v27  ;;  %2070 = vmatmul.mubr.msk.f32.gmra.mrb[12].mxu1 %vm1123_vm1, %v2319_v55  ;;  %v1022_v55 = vmul.f32 %v3010_v24, %v1006_v54  ;;  %v1021_v21 = vmul.f32 %v3030_v23, %v1005_v16  ;;  %v1009_v23 = vld [vmem:[#allocation3 + $0x60] sm:$0xff] }
 0x2c1   : > { %v2325_v32 = vpop.eup %2324  ;;  %v3110_v28 = vpop.permute.xlu0 %1386 }
 0x2c2   : > { %1057 = vadd.xlane.f32.xlu0 %v2325_v32  ;;  %2072 = vmatprep.mubr.msk.f32.mxu1 %vm1124_vm2, %v2325_v32  ;;  %v3077_v1 = vpop.eup %2326  ;;  %v3095_v51 = vpop.permute.xlu1 %1351 }
 0x2c3   : > { %2073 = vmatmul.mubr.msk.f32.gmra.mrb[14].mxu1 %vm1125_vm4, %v2323_v27  ;;  %v3080_v47 = vpop.eup %2328  ;;  %v1008_v27 = vld [vmem:[#allocation3 + $0x58] sm:$0xff] }
 0x2c4   : > { %v1024_v39 = vmul.f32 %v3018_v29, %v1008_v27 }
 0x2c6   : > { %v3099_v44 = vpop.permute.xlu1 %1361 }
 0x2ca   : > { %v3103_v53 = vpop.permute.xlu1 %1371 }
 0x2ce   : > { %v3107_v56 = vpop.permute.xlu1 %1381 }
 0x2d0   : > { %1391 = vperm.xlu1 %2265, %v3077_v1  }
 0x2d8   : > { %1396 = vperm.xlu0 %2264, %v3080_v47  }
 0x323   : > { %v1030_v4 = vpop.xlane.xlu1 %1029 }
 0x324   : > { %v1061_v5 = vadd.f32 %v1030_v4, %v1013_v57  ;;  %v1010_v4 = vld [vmem:[#allocation3 + $0x68] sm:$0xff] }
 0x326   : > { %1078 = vst.msk [vmem:[#allocation3] sm:$0xff] %vm1077_vm3, %v1061_v5  ;;  %v1026_v5 = vmul.f32 %v3024_v22, %v1010_v4  ;;  %v1027_v22 = vmul.f32 %v3077_v1, %v1011_v33  ;;  %v1305_v1 = vld [vmem:[#allocation4 + $0x10] sm:$0xff] }
 0x327   : > { %v1032_v60 = vpop.xlane.xlu0 %1031 }
 0x328   : > { %v1062_v59 = vadd.f32 %v1032_v60, %v1014_v8 }
 0x32a   : > { %1079 = vst.msk [vmem:[#allocation3 + $0x8] sm:$0xff] %vm1077_vm3, %v1062_v59  ;;  %v1012_v59 = vld [vmem:[#allocation3 + $0x78] sm:$0xff] }
 0x32b   : > { %v1036_v13 = vpop.xlane.xlu1 %1035 }
 0x32c   : > { %v1064_v36 = vadd.f32 %v1036_v13, %v1016_v61  ;;  %v1025_v61 = vmul.f32 %v3036_v38, %v1009_v23  ;;  %v1028_v13 = vmul.f32 %v3080_v47, %v1012_v59  ;;  %v1304_v38 = vld [vmem:[#allocation4 + $0x8] sm:$0xff]  ;;  %v1315_v59 = vld [vmem:[#allocation4 + $0x60] sm:$0xff] }
 0x32e   : > { %1081 = vst.msk [vmem:[#allocation3 + $0x18] sm:$0xff] %vm1077_vm3, %v1064_v36 }
 0x32f   : > { %v1034_v41 = vpop.xlane.xlu0 %1033 }
 0x330   : > { %v1063_v62 = vadd.f32 %v1034_v41, %v1015_v35 }
 0x332   : > { %1080 = vst.msk [vmem:[#allocation3 + $0x10] sm:$0xff] %vm1077_vm3, %v1063_v62 }
 0x333   : > { %v1040_v17 = vpop.xlane.xlu1 %1039 }
 0x334   : > { %v1066_v9 = vadd.f32 %v1040_v17, %v1018_v25  ;;  %v1303_v25 = vld [vmem:[#allocation4] sm:$0xff]  ;;  %v1400_v17 = vmul.f32 %v3083_v48, %v1304_v38  ;;  %v1308_v48 = vld [vmem:[#allocation4 + $0x28] sm:$0xff] }
 0x335   : > { %v1399_v47 = vmul.f32 %v3085_v34, %v1303_v25  ;;  %v1307_v34 = vld [vmem:[#allocation4 + $0x20] sm:$0xff] }
 0x336   : > { %1083 = vst.msk [vmem:[#allocation3 + $0x28] sm:$0xff] %vm1077_vm3, %v1066_v9 }
 0x337   : > { %v1038_v37 = vpop.xlane.xlu0 %1037 }
 0x338   : > { %v1065_v20 = vadd.f32 %v1038_v37, %v1017_v14 }
 0x33a   : > { %1082 = vst.msk [vmem:[#allocation3 + $0x20] sm:$0xff] %vm1077_vm3, %v1065_v20  ;;  %v1402_v20 = vmul.f32 %v3089_v49, %v1306_v45  ;;  %v1310_v49 = vld [vmem:[#allocation4 + $0x38] sm:$0xff] }
 0x33b   : > { %v1044_v46 = vpop.xlane.xlu1 %1043  ;;  %v1406_v27 = vmul.f32 %v3097_v52, %v1310_v49 }
 0x33c   : > { %v1068_v63 = vadd.f32 %v1044_v46, %v1020_v26  ;;  %v1401_v26 = vmul.f32 %v3087_v43, %v1305_v1  ;;  %v1309_v43 = vld [vmem:[#allocation4 + $0x30] sm:$0xff]  ;;  %v1468_v1 = vld [vmem:[#allocation3 + $0x8] sm:$0xff] (!%p1891_p8) }
 0x33e   : > { %1085 = vst.msk [vmem:[#allocation3 + $0x38] sm:$0xff] %vm1077_vm3, %v1068_v63 }
 0x33f   : > { %v1042_v15 = vpop.xlane.xlu0 %1041 }
 0x340   : > { %v1048_v30 = vpop.xlane.xlu1 %1047  ;;  %v1067_v0 = vadd.f32 %v1042_v15, %v1019_v19  ;;  %v1404_v19 = vmul.f32 %v3093_v42, %v1308_v48 }
 0x341   : > { %v1070_v32 = vadd.f32 %v1048_v30, %v1022_v55  ;;  %v1403_v55 = vmul.f32 %v3091_v3, %v1307_v34 }
 0x342   : > { %1084 = vst.msk [vmem:[#allocation3 + $0x30] sm:$0xff] %vm1077_vm3, %v1067_v0 }
 0x343   : > { %1087 = vst.msk [vmem:[#allocation3 + $0x48] sm:$0xff] %vm1077_vm3, %v1070_v32  ;;  %v1046_v40 = vpop.xlane.xlu0 %1045  ;;  %v1312_v32 = vld [vmem:[#allocation4 + $0x48] sm:$0xff] }
 0x344   : > { %v1052_v57 = vpop.xlane.xlu1 %1051  ;;  %v1069_v31 = vadd.f32 %v1046_v40, %v1021_v21  ;;  %v1405_v21 = vmul.f32 %v3095_v51, %v1309_v43  ;;  %v1311_v40 = vld [vmem:[#allocation4 + $0x40] sm:$0xff]  ;;  %v1408_v3 = vmul.f32 %v3101_v50, %v1312_v32  ;;  %v1316_v51 = vld [vmem:[#allocation4 + $0x68] sm:$0xff] }
 0x345   : > { %v1072_v24 = vadd.f32 %v1052_v57, %v1024_v39  ;;  %v1407_v4 = vmul.f32 %v3099_v44, %v1311_v40  ;;  %v1412_v44 = vmul.f32 %v3110_v28, %v1316_v51 }
 0x346   : > { %1086 = vst.msk [vmem:[#allocation3 + $0x40] sm:$0xff] %vm1077_vm3, %v1069_v31  ;;  %v1314_v31 = vld [vmem:[#allocation4 + $0x58] sm:$0xff] }
 0x347   : > { %1089 = vst.msk [vmem:[#allocation3 + $0x58] sm:$0xff] %vm1077_vm3, %v1072_v24  ;;  %v1050_v8 = vpop.xlane.xlu0 %1049  ;;  %v1410_v23 = vmul.f32 %v3105_v2, %v1314_v31  ;;  %v1317_v2 = vld [vmem:[#allocation4 + $0x70] sm:$0xff] }
 0x348   : > { %v1056_v60 = vpop.xlane.xlu1 %1055  ;;  %v1071_v12 = vadd.f32 %v1050_v8, %v1023_v58  ;;  %v1313_v58 = vld [vmem:[#allocation4 + $0x50] sm:$0xff] }
 0x349   : > { %v1074_v29 = vadd.f32 %v1056_v60, %v1026_v5  ;;  %v1409_v60 = vmul.f32 %v3103_v53, %v1313_v58  ;;  %v1473_v48 = vld [vmem:[#allocation3 + $0x30] sm:$0xff] (!%p1891_p8) }
 0x34a   : > { %1088 = vst.msk [vmem:[#allocation3 + $0x50] sm:$0xff] %vm1077_vm3, %v1071_v12 }
 0x34b   : > { %1091 = vst.msk [vmem:[#allocation3 + $0x68] sm:$0xff] %vm1077_vm3, %v1074_v29  ;;  %v1054_v7 = vpop.xlane.xlu0 %1053 }
 0x34c   : > { %v1060_v36 = vpop.xlane.xlu1 %1059  ;;  %v1073_v35 = vadd.f32 %v1054_v7, %v1025_v61  ;;  %v1318_v7 = vld [vmem:[#allocation4 + $0x78] sm:$0xff] }
 0x34d   : > { %v1076_v41 = vadd.f32 %v1060_v36, %v1028_v13  ;;  %v1411_v13 = vmul.f32 %v3107_v56, %v1315_v59  ;;  %v1469_v56 = vld [vmem:[#allocation3 + $0x10] sm:$0xff] (!%p1891_p8) }
 0x34e   : > { %1090 = vst.msk [vmem:[#allocation3 + $0x60] sm:$0xff] %vm1077_vm3, %v1073_v35  ;;  %v1478_v43 = vld [vmem:[#allocation3 + $0x58] sm:$0xff] (!%p1891_p8) }
 0x34f   : > { %1093 = vst.msk [vmem:[#allocation3 + $0x78] sm:$0xff] %vm1077_vm3, %v1076_v41  ;;  %v1058_v10 = vpop.xlane.xlu0 %1057 }
 0x350   : > { %v1075_v62 = vadd.f32 %v1058_v10, %v1027_v22  ;;  %v1392_v35 = vpop.permute.xlu1 %1391 }
 0x351   : > { %v1477_v32 = vld [vmem:[#allocation3 + $0x50] sm:$0xff] (!%p1891_p8) }
 0x352   : > { %1092 = vst.msk [vmem:[#allocation3 + $0x70] sm:$0xff] %vm1077_vm3, %v1075_v62  ;;  %v1413_v62 = vmul.f32 %v1392_v35, %v1317_v2  ;;  %v1493_v40 = vmul.f32 (!%p1891_p8), 0.7, %v1477_v32 }
 0x357   : > { %v1397_v33 = vpop.permute.xlu0 %1396 }
 0x358   : > { %v1414_v10 = vmul.f32 %v1397_v33, %v1318_v7 }
 0x36d   : > { %v2053_v18 = vpop.f32.mrb[0].mxu1 }
 0x36e   : > { %v1416_v9 = vadd.f32 %v2053_v18, %v1400_v17  ;;  %v1224_v14 = vpop.f32.mrb[1].mxu1  ;;  %v1470_v18 = vld [vmem:[#allocation3 + $0x18] sm:$0xff] (!%p1891_p8) }
 0x36f   : > { %v1415_v37 = vadd.f32 %v1399_v47, %v1224_v14  ;;  %v1467_v47 = vld [vmem:[#allocation3] sm:$0xff] (!%p1891_p8)  ;;  %v1485_v14 = vmul.f32 (!%p1891_p8), 0.7, %v1469_v56  ;;  %v1486_v45 = vmul.f32 (!%p1891_p8), 0.7, %v1470_v18 }
 0x370   : > { %1432 = vst [vmem:[#allocation4 + $0x8] sm:$0xff] %v1416_v9  ;;  %v2495_v9 = vmov (!%p1891_p8), 0  }
 0x371   : > { %1431 = vst [vmem:[#allocation4] sm:$0xff] %v1415_v37  ;;  %2331 = vset.pattern.permute.xlu1 (!%p1891_p8), %v2495_v9  ;;  %2330 = vset.pattern.permute.xlu0 (!%p1891_p8), %v2495_v9  ;;  %v1483_v37 = vmul.f32 (!%p1891_p8), 0.7, %v1467_v47  ;;  %2332 = vrcp.f32 (!%p1891_p8), %v1485_v14 }
 0x373   : > { %2334 = vrcp.f32 (!%p1891_p8), %v1483_v37 }
 0x374   : > { %2336 = vrcp.f32 (!%p1891_p8), %v1486_v45 }
 0x376   : > { %v2056_v46 = vpop.f32.mrb[2].mxu1 }
 0x377   : > { %v1418_v11 = vadd.f32 %v2056_v46, %v1402_v20  ;;  %v1234_v63 = vpop.f32.mrb[3].mxu1  ;;  %v1472_v20 = vld [vmem:[#allocation3 + $0x28] sm:$0xff] (!%p1891_p8)  ;;  %v1471_v46 = vld [vmem:[#allocation3 + $0x20] sm:$0xff] (!%p1891_p8) }
 0x378   : > { %v1417_v54 = vadd.f32 %v1401_v26, %v1234_v63  ;;  %v1484_v26 = vmul.f32 (!%p1891_p8), 0.7, %v1468_v1  ;;  %v1487_v63 = vmul.f32 (!%p1891_p8), 0.7, %v1471_v46  ;;  %v1531_v7 = vld [vmem:[#allocation4] sm:$0xff] (!%p1891_p8) }
 0x379   : > { %1434 = vst [vmem:[#allocation4 + $0x18] sm:$0xff] %v1418_v11  ;;  %v1488_v11 = vmul.f32 (!%p1891_p8), 0.7, %v1472_v20 }
 0x37a   : > { %1433 = vst [vmem:[#allocation4 + $0x10] sm:$0xff] %v1417_v54  ;;  %2338 = vrcp.f32 (!%p1891_p8), %v1484_v26  ;;  %v1474_v54 = vld [vmem:[#allocation3 + $0x38] sm:$0xff] (!%p1891_p8) }
 0x37b   : > { %2340 = vrcp.f32 (!%p1891_p8), %v1488_v11  ;;  %v1490_v34 = vmul.f32 (!%p1891_p8), 0.7, %v1474_v54 }
 0x37c   : > { %2342 = vrcp.f32 (!%p1891_p8), %v1487_v63 }
 0x37d   : > { %2344 = vrcp.f32 (!%p1891_p8), %v1490_v34 }
 0x37e   : > { %v2059_v15 = vpop.f32.mrb[4].mxu1 }
 0x37f   : > { %v1420_v16 = vadd.f32 %v2059_v15, %v1404_v19  ;;  %v1244_v30 = vpop.f32.mrb[5].mxu1  ;;  %v1489_v19 = vmul.f32 (!%p1891_p8), 0.7, %v1473_v48  ;;  %v1475_v15 = vld [vmem:[#allocation3 + $0x40] sm:$0xff] (!%p1891_p8) }
 0x380   : > { %v1419_v0 = vadd.f32 %v1403_v55, %v1244_v30  ;;  %v1476_v55 = vld [vmem:[#allocation3 + $0x48] sm:$0xff] (!%p1891_p8)  ;;  %v1491_v49 = vmul.f32 (!%p1891_p8), 0.7, %v1475_v15 }
 0x381   : > { %1436 = vst [vmem:[#allocation4 + $0x28] sm:$0xff] %v1420_v16  ;;  %v2333_v16 = vpop.eup (!%p1891_p8), %2332  ;;  %v1492_v30 = vmul.f32 (!%p1891_p8), 0.7, %v1476_v55  ;;  %2346 = vrcp.f32 (!%p1891_p8), %v1489_v19 }
 0x382   : > { %1435 = vst [vmem:[#allocation4 + $0x20] sm:$0xff] %v1419_v0  ;;  %v2335_v0 = vpop.eup (!%p1891_p8), %2334  ;;  %1559 = vperm.xlu1 (!%p1891_p8), %2331, %v2333_v16  }
 0x383   : > { %1549 = vperm.xlu0 (!%p1891_p8), %2330, %v2335_v0   ;;  %2348 = vrcp.f32 (!%p1891_p8), %v1492_v30 }
 0x384   : > { %2350 = vrcp.f32 (!%p1891_p8), %v1491_v49 }
 0x386   : > { %v2062_v39 = vpop.f32.mrb[6].mxu1 }
 0x387   : > { %v1422_v6 = vadd.f32 %v2062_v39, %v1406_v27  ;;  %v1254_v57 = vpop.f32.mrb[7].mxu1  ;;  %v2337_v27 = vpop.eup (!%p1891_p8), %2336  ;;  %v1494_v39 = vmul.f32 (!%p1891_p8), 0.7, %v1478_v43 }
 0x388   : > { %v1421_v42 = vadd.f32 %v1405_v21, %v1254_v57  ;;  %v2339_v21 = vpop.eup (!%p1891_p8), %2338  ;;  %1564 = vperm.xlu1 (!%p1891_p8), %2331, %v2337_v27  }
 0x389   : > { %1438 = vst [vmem:[#allocation4 + $0x38] sm:$0xff] %v1422_v6  ;;  %v1480_v6 = vld [vmem:[#allocation3 + $0x68] sm:$0xff] (!%p1891_p8)  ;;  %v2341_v57 = vpop.eup (!%p1891_p8), %2340  ;;  %1554 = vperm.xlu0 (!%p1891_p8), %2330, %v2339_v21   ;;  %2352 = vrcp.f32 (!%p1891_p8), %v1494_v39 }
 0x38a   : > { %1437 = vst [vmem:[#allocation4 + $0x30] sm:$0xff] %v1421_v42  ;;  %v2065_v24 = vpop.f32.mrb[8].mxu1  ;;  %v1479_v42 = vld [vmem:[#allocation3 + $0x60] sm:$0xff] (!%p1891_p8)  ;;  %v1496_v31 = vmul.f32 (!%p1891_p8), 0.7, %v1480_v6  ;;  %2354 = vrcp.f32 (!%p1891_p8), %v1493_v40 }
 0x38b   : > { %v1424_v5 = vadd.f32 %v2065_v24, %v1408_v3  ;;  %v1264_v8 = vpop.f32.mrb[9].mxu1  ;;  %v2343_v3 = vpop.eup (!%p1891_p8), %2342  ;;  %v1482_v24 = vld [vmem:[#allocation3 + $0x78] sm:$0xff] (!%p1891_p8) }
 0x38c   : > { %v1423_v52 = vadd.f32 %v1407_v4, %v1264_v8  ;;  %1574 = vperm.xlu1 (!%p1891_p8), %2331, %v2341_v57   ;;  %v1495_v4 = vmul.f32 (!%p1891_p8), 0.7, %v1479_v42  ;;  %v2345_v58 = vpop.eup (!%p1891_p8), %2344  ;;  %2356 = vrcp.f32 (!%p1891_p8), %v1496_v31 }
 0x38d   : > { %1440 = vst [vmem:[#allocation4 + $0x48] sm:$0xff] %v1424_v5  ;;  %1569 = vperm.xlu0 (!%p1891_p8), %2330, %v2343_v3   ;;  %v1481_v5 = vld [vmem:[#allocation3 + $0x70] sm:$0xff] (!%p1891_p8)  ;;  %v2347_v8 = vpop.eup (!%p1891_p8), %2346 }
 0x38e   : > { %1439 = vst [vmem:[#allocation4 + $0x40] sm:$0xff] %v1423_v52  ;;  %v2068_v12 = vpop.f32.mrb[10].mxu1  ;;  %v1498_v52 = vmul.f32 (!%p1891_p8), 0.7, %v1482_v24  ;;  %2358 = vrcp.f32 (!%p1891_p8), %v1495_v4  ;;  %v2349_v51 = vpop.eup (!%p1891_p8), %2348 }
 0x38f   : > { %v1426_v50 = vadd.f32 %v2068_v12, %v1410_v23  ;;  %v1274_v29 = vpop.f32.mrb[11].mxu1  ;;  %v1497_v23 = vmul.f32 (!%p1891_p8), 0.7, %v1481_v5 }
 0x390   : > { %v1425_v61 = vadd.f32 %v1409_v60, %v1274_v29  ;;  %1584 = vperm.xlu1 (!%p1891_p8), %2331, %v2345_v58   ;;  %v2351_v60 = vpop.eup (!%p1891_p8), %2350  ;;  %2360 = vrcp.f32 (!%p1891_p8), %v1498_v52  ;;  %v1538_v9 = vld [vmem:[#allocation4 + $0x38] sm:$0xff] (!%p1891_p8) }
 0x391   : > { %1442 = vst [vmem:[#allocation4 + $0x58] sm:$0xff] %v1426_v50  ;;  %1579 = vperm.xlu0 (!%p1891_p8), %2330, %v2347_v8   ;;  %2362 = vrcp.f32 (!%p1891_p8), %v1497_v23  ;;  %v1537_v14 = vld [vmem:[#allocation4 + $0x30] sm:$0xff] (!%p1891_p8) }
 0x392   : > { %1441 = vst [vmem:[#allocation4 + $0x50] sm:$0xff] %v1425_v61  ;;  %v2071_v36 = vpop.f32.mrb[12].mxu1 }
 0x393   : > { %v1428_v41 = vadd.f32 %v2071_v36, %v1412_v44  ;;  %v1284_v22 = vpop.f32.mrb[13].mxu1  ;;  %v2353_v12 = vpop.eup (!%p1891_p8), %2352 }
 0x394   : > { %v1427_v53 = vadd.f32 %v1411_v13, %v1284_v22  ;;  %1466 = sbr.rel (%p1891_p8) target bundleno = 1060 (0x424), region = 82  ;;  %1594 = vperm.xlu1 (!%p1891_p8), %2331, %v2349_v51   ;;  %v2355_v59 = vpop.eup (!%p1891_p8), %2354  ;;  %v1533_v13 = vld [vmem:[#allocation4 + $0x10] sm:$0xff] (!%p1891_p8)  ;;  %v1532_v22 = vld [vmem:[#allocation4 + $0x8] sm:$0xff] (!%p1891_p8) }
 0x395   : > { %1444 = vst [vmem:[#allocation4 + $0x68] sm:$0xff] %v1428_v41  ;;  %1589 = vperm.xlu0 (!%p1891_p8), %2330, %v2351_v60   ;;  %v1534_v41 = vld [vmem:[#allocation4 + $0x18] sm:$0xff] (!%p1891_p8)  ;;  %v1540_v26 = vld [vmem:[#allocation4 + $0x48] sm:$0xff] (!%p1891_p8)  ;;  %v1539_v46 = vld [vmem:[#allocation4 + $0x40] sm:$0xff] (!%p1891_p8) }
 0x396   : > { %1443 = vst [vmem:[#allocation4 + $0x60] sm:$0xff] %v1427_v53  ;;  %v2074_v38 = vpop.f32.mrb[14].mxu1  ;;  %v2357_v50 = vpop.eup (!%p1891_p8), %2356 }
 0x397   : > { %v1430_v25 = vadd.f32 %v2074_v38, %v1414_v10  ;;  %v1294_v17 = vpop.f32.mrb[15].mxu1 }
 0x398   : > { %v1429_v28 = vadd.f32 %v1413_v62, %v1294_v17  ;;  %1604 = vperm.xlu1 (!%p1891_p8), %2331, %v2353_v12   ;;  %v2359_v29 = vpop.eup (!%p1891_p8), %2358  ;;  %v1535_v17 = vld [vmem:[#allocation4 + $0x20] sm:$0xff] (!%p1891_p8)  ;;  %v1542_v34 = vld [vmem:[#allocation4 + $0x58] sm:$0xff] (!%p1891_p8) }
 0x399   : > { %1446 = vst [vmem:[#allocation4 + $0x78] sm:$0xff] %v1430_v25  ;;  %1599 = vperm.xlu0 (!%p1891_p8), %2330, %v2355_v59   ;;  %v1536_v25 = vld [vmem:[#allocation4 + $0x28] sm:$0xff] (!%p1891_p8)  ;;  %v1541_v19 = vld [vmem:[#allocation4 + $0x50] sm:$0xff] (!%p1891_p8) }
 0x39a   : > { %1445 = vst [vmem:[#allocation4 + $0x70] sm:$0xff] %v1429_v28  ;;  %v2361_v61 = vpop.eup (!%p1891_p8), %2360 }
 0x39b   : > { %v2363_v44 = vpop.eup %2362 }
 0x39c   : > { %1614 = vperm.xlu1 %2331, %v2357_v50   ;;  %v1544_v0 = vld [vmem:[#allocation4 + $0x68] sm:$0xff] }
 0x39d   : > { %1609 = vperm.xlu0 %2330, %v2359_v29   ;;  %v1543_v49 = vld [vmem:[#allocation4 + $0x60] sm:$0xff] }
 0x3a0   : > { %1624 = vperm.xlu1 %2331, %v2361_v61   ;;  %v1546_v39 = vld [vmem:[#allocation4 + $0x78] sm:$0xff] }
 0x3a1   : > { %1619 = vperm.xlu0 %2330, %v2363_v44   ;;  %v1545_v40 = vld [vmem:[#allocation4 + $0x70] sm:$0xff] }
 0x401   : > { %v1560_v33 = vpop.permute.xlu1 %1559 }
 0x402   : > { %v1629_v36 = vmul.f32 %v1560_v33, %v1533_v13  ;;  %v1550_v2 = vpop.permute.xlu0 %1549 }
 0x403   : > { %v1627_v35 = vmul.f32 %v1550_v2, %v1531_v7 }
 0x404   : > { %1645 = vst [vmem:[%s2689_s12 + $0x10] sm:$0xff] %v1629_v36 }
 0x405   : > { %1643 = vst [vmem:[%s2689_s12] sm:$0xff] %v1627_v35 }
 0x407   : > { %v1565_v53 = vpop.permute.xlu1 %1564 }
 0x408   : > { %v1630_v10 = vmul.f32 %v1565_v53, %v1534_v41  ;;  %v1555_v62 = vpop.permute.xlu0 %1554 }
 0x409   : > { %v1628_v38 = vmul.f32 %v1555_v62, %v1532_v22 }
 0x40a   : > { %1646 = vst [vmem:[%s2689_s12 + $0x18] sm:$0xff] %v1630_v10 }
 0x40b   : > { %1644 = vst [vmem:[%s2689_s12 + $0x8] sm:$0xff] %v1628_v38  ;;  %v1575_v28 = vpop.permute.xlu1 %1574 }
 0x40c   : > { %v1632_v56 = vmul.f32 %v1575_v28, %v1536_v25  ;;  %v1570_v47 = vpop.permute.xlu0 %1569 }
 0x40d   : > { %v1631_v18 = vmul.f32 %v1570_v47, %v1535_v17 }
 0x40e   : > { %1648 = vst [vmem:[%s2689_s12 + $0x28] sm:$0xff] %v1632_v56 }
 0x40f   : > { %1647 = vst [vmem:[%s2689_s12 + $0x20] sm:$0xff] %v1631_v18  ;;  %v1585_v37 = vpop.permute.xlu1 %1584 }
 0x410   : > { %v1634_v45 = vmul.f32 %v1585_v37, %v1538_v9  ;;  %v1580_v1 = vpop.permute.xlu0 %1579 }
 0x411   : > { %v1633_v20 = vmul.f32 %v1580_v1, %v1537_v14 }
 0x412   : > { %1650 = vst [vmem:[%s2689_s12 + $0x38] sm:$0xff] %v1634_v45 }
 0x413   : > { %1649 = vst [vmem:[%s2689_s12 + $0x30] sm:$0xff] %v1633_v20  ;;  %v1595_v11 = vpop.permute.xlu1 %1594 }
 0x414   : > { %v1636_v63 = vmul.f32 %v1595_v11, %v1540_v26  ;;  %v1590_v54 = vpop.permute.xlu0 %1589 }
 0x415   : > { %v1635_v48 = vmul.f32 %v1590_v54, %v1539_v46 }
 0x416   : > { %1652 = vst [vmem:[%s2689_s12 + $0x48] sm:$0xff] %v1636_v63 }
 0x417   : > { %1651 = vst [vmem:[%s2689_s12 + $0x40] sm:$0xff] %v1635_v48  ;;  %v1605_v55 = vpop.permute.xlu1 %1604 }
 0x418   : > { %v1638_v15 = vmul.f32 %v1605_v55, %v1542_v34  ;;  %v1600_v16 = vpop.permute.xlu0 %1599 }
 0x419   : > { %v1637_v30 = vmul.f32 %v1600_v16, %v1541_v19 }
 0x41a   : > { %1654 = vst [vmem:[%s2689_s12 + $0x58] sm:$0xff] %v1638_v15 }
 0x41b   : > { %1653 = vst [vmem:[%s2689_s12 + $0x50] sm:$0xff] %v1637_v30  ;;  %v1615_v43 = vpop.permute.xlu1 %1614 }
 0x41c   : > { %v1640_v27 = vmul.f32 %v1615_v43, %v1544_v0  ;;  %v1610_v32 = vpop.permute.xlu0 %1609 }
 0x41d   : > { %v1639_v21 = vmul.f32 %v1610_v32, %v1543_v49 }
 0x41e   : > { %1656 = vst [vmem:[%s2689_s12 + $0x68] sm:$0xff] %v1640_v27 }
 0x41f   : > { %1655 = vst [vmem:[%s2689_s12 + $0x60] sm:$0xff] %v1639_v21  ;;  %v1625_v6 = vpop.permute.xlu1 %1624 }
 0x420   : > { %v1642_v57 = vmul.f32 %v1625_v6, %v1546_v39  ;;  %v1620_v42 = vpop.permute.xlu0 %1619 }
 0x421   : > { %v1641_v3 = vmul.f32 %v1620_v42, %v1545_v40 }
 0x422   : > { %1658 = vst [vmem:[%s2689_s12 + $0x78] sm:$0xff] %v1642_v57 }
 0x423   : > { %1657 = vst [vmem:[%s2689_s12 + $0x70] sm:$0xff] %v1641_v3 }
 0x424 PF: > { %s1894_s3 = sshll.u32 %s2474_s22, 5  ;;  %s1675_s19 = sshll.u32 %s2689_s12, 4  ;;  %s3177_s19 = int_to_ptr.vmem [resolvable:$true] %s1675_s19 }
 0x425   : > { %s1672_s15 = sadd.s32 %s1894_s3, %s2665_s11  ;;  %s3280_s30 = sand.u32 1, %s2450_s16  }
 0x426   : > { %s1895_s20 = sshll.u32 %s1672_s15, 7  ;;  %s3186_s7 = scalar_lea.sflag [#allocation7], %s3280_s30 }
 0x427   : > { %s3182_s25 = scalar_lea.hbm %s3254_s4, %s1895_s20  ;;  %s2364_s27 = scalar_lea.vmem %s3177_s19, 2048 }
 0x428   : > { %p2365_p10 = scmp.ne.s32.totalorder %s3177_s19, %s2364_s27  ;;  %s2496_s22 = smov [#allocation6]  }
 0x429   : > { %s2368_s11 = sshll.u32 %s2496_s22, 4  ;;  %s2369_s11 = int_to_ptr.vmem [resolvable:$false] %s2368_s11 }
 0x42a   : > { %p2366_p12 = pnand %p2365_p10, %p2608_p9  ;;  %s2370_s9 = scalar_lea.vmem %s2369_s11, 4096 }
 0x42b   : > { %p2371_p0 = scmp.lt.s32.totalorder %s3177_s19, %s2369_s11  ;;  %p2372_p1 = scmp.lt.s32.totalorder %s2370_s9, %s2364_s27 }
 0x42c   : > { %p2367_p13 = pneg %p2366_p12 }
 0x42d   : > { %p2373_p2 = por %p2372_p1, %p2371_p0 }
 0x42f   : > { %p2374_p3 = pnand %p2373_p2, %p2367_p13 }
 0x431   : > { %2377 = shalt.err (!%p2374_p3)
}
 0x432   : > { %s2378_s14 = scalar_lea.hbm %s3182_s25, 2048  ;;  %s2382_s5 = scalar_lea.hbm %s3254_s4, 8192 }
 0x433   : > { %p2379_p4 = scmp.ne.s32.totalorder %s3182_s25, %s2378_s14  ;;  %p2383_p7 = scmp.lt.u32.totalorder %s3182_s25, %s3254_s4 }
 0x434   : > { %p2384_p8 = scmp.lt.u32.totalorder %s2382_s5, %s2378_s14  ;;  %p2386_p12 = scmp.lt.u32.totalorder %s2378_s14, %s3182_s25 }
 0x435   : > { %p2380_p5 = pnand %p2379_p4, %p2608_p9 }
 0x436   : > { %p2385_p10 = por %p2384_p8, %p2383_p7 }
 0x437   : > { %p2381_p6 = pneg %p2380_p5 }
 0x438   : > { %p2387_p13 = por %p2386_p12, %p2385_p10 }
 0x43a   : > { %p2388_p0 = pnand %p2387_p13, %p2381_p6 }
 0x43c   : > { %2391 = shalt.err (!%p2388_p0)
}
 0x43d   : > { %s2497_s29 = smov 128   ;;  %s2498_s12 = smov 8  }
 0x43e   : > { %2155 = dma.vmem_to_hbm [thread:$0]  (%p2608_p9), %s3177_s19, 2048, %s3182_s25, %s3186_s7, %s2497_s29, %s2497_s29, %s2498_s12  }
 0x43f PF: > { %s3281_s3 = sld [smem:[#allocation9_spill]]  ;;  %p2161_p1 = scmp.ge.s32.totalorder %s2490_s26, 2 }
 0x441   : > { %p2158_p2 = pnand %p2161_p1, %p2616_p11 }
 0x445   : > { %s1690_s15 = sand.u32 1, %s3281_s3  }
 0x446   : > { %s1691_s20 = scalar_lea.sflag [#allocation7], %s1690_s15 }
 0x447   : > { %2441 = dma.done.wait (!%p2158_p2), %s1691_s20, 2048  }
 0x448   : > { %2443 = vsyncadd (!%p2158_p2), %s1691_s20, 4294965248  ;;  %s17_s26 = sadd.s32 1, %s2490_s26   ;;  %s3282_s18 = sld [smem:[#allocation10_spill]] }
 0x449   : > { %p14_p3 = scmp.ge.s32.totalorder %s17_s26, 10   ;;  %s3283_s19 = sld [smem:[#allocation17_spill]] }
 0x44a   : > { %s3284_s20 = sld [smem:[#allocation11_spill]]  ;;  %s3285_s21 = sld [smem:[#allocation12_spill]] }
 0x44b   : > { %s3286_s22 = sld [smem:[#allocation13_spill]]  ;;  %s3287_s23 = sld [smem:[#allocation14_spill]] }
 0x44c   : > { %s3288_s24 = sld [smem:[#allocation15_spill]]  ;;  %s3289_s25 = sld [smem:[#allocation16_spill]] }
 0x44d   : > { %s3290_s15 = smov %s2450_s16  ;;  %s3291_s16 = smov %s2454_s17 }
 0x44e   : > { %s3292_s17 = smov %s2625_s28  ;;  %16 = sbr.rel (!%p14_p3) target bundleno = 9 (0x9), region = 131 }
 0x455   :  { %1696 = vsyncpa [#allocation7], 1 }
 0x456   :  { %1698 = vsyncpa [#allocation7 + $0x1], 1 }

</bundles_post_ra>
